<compile_context>
chip_gen: v7x
topology: tpu7x:2x2x1
jax: 0.10.0
libtpu: 0.0.40
codegen_flags: <defaults>
</compile_context>

<pallas_src>
import functools

import jax
import jax.numpy as jnp
from jax.experimental import pallas as pl
from jax.experimental.pallas import tpu as pltpu


def _double_conv_kernel(x_ref, w1_ref, g1_ref, be1_ref, w2_ref, g2_ref, be2_ref,
                        o_ref, h1p_ref, *, K: int, pad: int, eps: float):
    # x_ref   : (N, Cin, L + 2*pad)   pre-padded input, NCL (length on lanes)
    # w*_ref  : (Cin*K, Cout, 1)      conv taps, row i*K+k holds w_pt[:, i, k]
    # g*/be*  : (Cout, 1)             BatchNorm gamma / beta
    # o_ref   : (N, Cout, L)          output, NCL (lane-dense store on L)
    # h1p_ref : (N, Cout, L + 2*pad)  VMEM scratch for the padded mid activation
    N, Cout, L = o_ref.shape
    inv_count = 1.0 / float(N * L)

    def conv_same(xp_ref, w_ref):
        # "same" Conv1d as K*cin shifted multiply-adds on the VPU.
        # Channels this small (<1% MXU utilization) are cheaper as broadcast FMAs;
        # taps are read as static lane-slices of the (pre-)padded source ref, so no
        # im2col / concat / reshape copies are materialized in VMEM.
        cin = xp_ref.shape[1]
        w = w_ref[...].astype(jnp.float32)               # (cin*K, Cout, 1), tiny
        acc = None
        for i in range(cin):
            for k in range(K):
                xs = xp_ref[:, i:i + 1, k:k + L]          # (N, 1, L)   shifted tap
                term = w[i * K + k][None] * xs            # (1,Cout,1)*(N,1,L)->(N,Cout,L)
                acc = term if acc is None else acc + term
        return acc                                        # (N, Cout, L) float32
        # NOTE: no "+ bias" — cancelled exactly by the training-mode BN below.

    def bn_relu(z, g_ref, be_ref):
        # Training-mode BatchNorm1d fused into one stats pass + one FMA+ReLU pass.
        s = jnp.sum(z, axis=(0, 2), keepdims=True)        # (1, Cout, 1)
        ss = jnp.sum(z * z, axis=(0, 2), keepdims=True)   # (1, Cout, 1)
        mean = s * inv_count
        var = ss * inv_count - mean * mean                # biased batch variance (f32)
        a = g_ref[...][None] * jax.lax.rsqrt(var + eps)   # (1, Cout, 1)  (rsqrt -> EUP)
        b = be_ref[...][None] - mean * a
        return jnp.maximum(z * a + b, 0.0)                # single FMA + ReLU pass

    # conv1 -> BN -> ReLU
    h1 = bn_relu(conv_same(x_ref, w1_ref), g1_ref, be1_ref)

    # Stage h1 with its zero halo once in VMEM scratch (no in-kernel concat/pad copies):
    # zero only the pad columns, write the body exactly once.
    h1p_ref[:, :, 0:pad] = jnp.zeros((N, Cout, pad), jnp.float32)
    h1p_ref[:, :, pad + L:pad + L + pad] = jnp.zeros((N, Cout, pad), jnp.float32)
    h1p_ref[:, :, pad:pad + L] = h1

    # conv2 -> BN -> ReLU, taps read straight from the padded scratch.
    h2 = bn_relu(conv_same(h1p_ref, w2_ref), g2_ref, be2_ref)
    o_ref[...] = h2.astype(o_ref.dtype)


def double_conv_forward(x_ncl, params, *, kernel_size=3):
    """x_ncl: (N, C_in, L) float32 (PyTorch NCL). Returns (N, C_out, L) — same layout,
    so no transposes are needed on either side of the kernel."""
    N, Cin, L = x_ncl.shape
    w1p, g1, be1, w2p, g2, be2 = params
    Cout = w1p.shape[1]
    K = kernel_size
    assert w1p.shape[0] == Cin * K and w2p.shape[0] == Cout * K
    pad = (K - 1) // 2                                    # PyTorch padding=1 for K=3

    # Wrapper-side layout glue only: zero-pad the length axis once.
    x_pad = jnp.pad(x_ncl.astype(jnp.float32), ((0, 0), (0, 0), (pad, pad)))

    args = (x_pad, w1p, g1, be1, w2p, g2, be2)
    in_specs = [pl.BlockSpec(a.shape, lambda i, nd=a.ndim: (0,) * nd) for a in args]
    out_spec = pl.BlockSpec((N, Cout, L), lambda i: (0, 0, 0))

    kernel = functools.partial(_double_conv_kernel, K=K, pad=pad, eps=1e-5)
    return pl.pallas_call(
        kernel,
        out_shape=jax.ShapeDtypeStruct((N, Cout, L), jnp.float32),
        grid=(1,),
        in_specs=in_specs,
        out_specs=out_spec,
        scratch_shapes=[pltpu.VMEM((N, Cout, L + 2 * pad), jnp.float32)],
        compiler_params=pltpu.CompilerParams(dimension_semantics=("arbitrary",)),
    )(*args)


def init_params(key, in_ch, out_ch, kernel_size=3):
    """Deterministic synthetic parameters. Conv weights are generated in PyTorch layout
    (out_ch, in_ch, K) and re-packed to (in_ch*K, out_ch, 1) — row i*K+k = w_pt[:, i, k] —
    so the kernel can broadcast a (Cout,1) weight column per tap with zero relayout.
    Conv biases are intentionally omitted: training-mode BatchNorm cancels them exactly."""
    k1, k2 = jax.random.split(key, 2)
    w1_pt = jax.random.normal(k1, (out_ch, in_ch, kernel_size), jnp.float32) * 0.1
    w2_pt = jax.random.normal(k2, (out_ch, out_ch, kernel_size), jnp.float32) * 0.1

    def pack(w_pt):
        o, i, k = w_pt.shape
        return jnp.transpose(w_pt, (1, 2, 0)).reshape(i * k, o)[..., None]  # (i*K, o, 1)

    g1 = jnp.ones((out_ch, 1), jnp.float32)     # BatchNorm1d weight init = 1
    be1 = jnp.zeros((out_ch, 1), jnp.float32)   # BatchNorm1d bias init = 0
    g2 = jnp.ones((out_ch, 1), jnp.float32)
    be2 = jnp.zeros((out_ch, 1), jnp.float32)
    return (pack(w1_pt), g1, be1, pack(w2_pt), g2, be2)


def _reference_double_conv(x, params, *, kernel_size=3, eps=1e-5):
    """Pure-JAX reference (same math as the PyTorch module in training mode)."""
    w1p, g1, be1, w2p, g2, be2 = params
    K = kernel_size
    pad = (K - 1) // 2

    def conv(h, wp):
        n, cin, ll = h.shape
        cout = wp.shape[1]
        hp = jnp.pad(h, ((0, 0), (0, 0), (pad, pad)))
        y = jnp.zeros((n, cout, ll), jnp.float32)
        for i in range(cin):
            for k in range(K):
                y = y + wp[i * K + k, :, 0][None, :, None] * hp[:, i:i + 1, k:k + ll]
        return y

    def bn_relu(z, g, be):
        mean = jnp.mean(z, axis=(0, 2), keepdims=True)
        var = jnp.mean((z - mean) ** 2, axis=(0, 2), keepdims=True)
        return jnp.maximum((z - mean) * jax.lax.rsqrt(var + eps) * g[None] + be[None], 0.0)

    h1 = bn_relu(conv(x, w1p), g1, be1)
    return bn_relu(conv(h1, w2p), g2, be2)


if __name__ == "__main__":
    key = jax.random.PRNGKey(0)
    kx, kp = jax.random.split(key)

    N, Cin, Cout, L = 2, 4, 8, 16               # small shapes; double_conv(in_ch=4, out_ch=8)
    x = jax.random.normal(kx, (N, Cin, L), jnp.float32)
    params = init_params(kp, Cin, Cout)

    y = double_conv_forward(x, params)
    y = jax.block_until_ready(y)

    assert y.shape == (N, Cout, L), y.shape
    assert bool(jnp.all(jnp.isfinite(y))) and bool(jnp.all(y >= 0.0))   # ReLU output

    y_ref = _reference_double_conv(x.astype(jnp.float32), params)
    assert bool(jnp.allclose(y, y_ref, atol=1e-3, rtol=1e-3)), "mismatch vs pure-JAX reference"

    print("KERNEL_OK")
</pallas_src>

<mosaic_0001>
module attributes {stable_mosaic.version = 11 : i64} {
  func.func @_double_conv_kernel(%arg0: i32, %arg1: memref<2x4x18xf32, #tpu.memory_space<vmem>>, %arg2: memref<12x8x1xf32, #tpu.memory_space<vmem>>, %arg3: memref<8x1xf32, #tpu.memory_space<vmem>>, %arg4: memref<8x1xf32, #tpu.memory_space<vmem>>, %arg5: memref<24x8x1xf32, #tpu.memory_space<vmem>>, %arg6: memref<8x1xf32, #tpu.memory_space<vmem>>, %arg7: memref<8x1xf32, #tpu.memory_space<vmem>>, %arg8: memref<2x8x16xf32, #tpu.memory_space<vmem>>, %arg9: memref<2x8x18xf32, #tpu.memory_space<vmem>>) attributes {dimension_semantics = [#tpu.dimension_semantics<arbitrary>], iteration_bounds = array<i64: 1>, scalar_prefetch = 0 : i64, scratch_operands = 1 : i64, tpu.core_type = #tpu.core_type<tc>, window_params = [{pipeline_mode = #tpu.pipeline_mode<synchronous>, transform_indices = @transform_0, window_bounds = array<i64: 2, 4, 18>}, {pipeline_mode = #tpu.pipeline_mode<synchronous>, transform_indices = @transform_1, window_bounds = array<i64: 12, 8, 1>}, {pipeline_mode = #tpu.pipeline_mode<synchronous>, transform_indices = @transform_2, window_bounds = array<i64: 8, 1>}, {pipeline_mode = #tpu.pipeline_mode<synchronous>, transform_indices = @transform_3, window_bounds = array<i64: 8, 1>}, {pipeline_mode = #tpu.pipeline_mode<synchronous>, transform_indices = @transform_4, window_bounds = array<i64: 24, 8, 1>}, {pipeline_mode = #tpu.pipeline_mode<synchronous>, transform_indices = @transform_5, window_bounds = array<i64: 8, 1>}, {pipeline_mode = #tpu.pipeline_mode<synchronous>, transform_indices = @transform_6, window_bounds = array<i64: 8, 1>}, {pipeline_mode = #tpu.pipeline_mode<synchronous>, transform_indices = @transform_7, window_bounds = array<i64: 2, 8, 16>}]} {
    %c0 = arith.constant 0 : index
    %c0_0 = arith.constant 0 : index
    %c0_1 = arith.constant 0 : index
    %0 = vector.load %arg2[%c0, %c0_0, %c0_1] : memref<12x8x1xf32, #tpu.memory_space<vmem>>, vector<12x8x1xf32>
    %c0_2 = arith.constant 0 : index
    %c0_3 = arith.constant 0 : index
    %c0_4 = arith.constant 0 : index
    %1 = vector.load %arg1[%c0_2, %c0_3, %c0_4] : memref<2x4x18xf32, #tpu.memory_space<vmem>>, vector<2x1x16xf32>
    %2 = vector.extract_strided_slice %0 {offsets = [0, 0, 0], sizes = [1, 8, 1], strides = [1, 1, 1]} : vector<12x8x1xf32> to vector<1x8x1xf32>
    %3 = vector.shape_cast %2 : vector<1x8x1xf32> to vector<8x1xf32>
    %4 = vector.shape_cast %3 : vector<8x1xf32> to vector<1x8x1xf32>
    %5 = vector.broadcast %4 : vector<1x8x1xf32> to vector<2x8x16xf32>
    %6 = vector.broadcast %1 : vector<2x1x16xf32> to vector<2x8x16xf32>
    %7 = arith.mulf %5, %6 : vector<2x8x16xf32>
    %c0_5 = arith.constant 0 : index
    %c0_6 = arith.constant 0 : index
    %c1 = arith.constant 1 : index
    %8 = vector.load %arg1[%c0_5, %c0_6, %c1] : memref<2x4x18xf32, #tpu.memory_space<vmem>>, vector<2x1x16xf32>
    %9 = vector.extract_strided_slice %0 {offsets = [1, 0, 0], sizes = [1, 8, 1], strides = [1, 1, 1]} : vector<12x8x1xf32> to vector<1x8x1xf32>
    %10 = vector.shape_cast %9 : vector<1x8x1xf32> to vector<8x1xf32>
    %11 = vector.shape_cast %10 : vector<8x1xf32> to vector<1x8x1xf32>
    %12 = vector.broadcast %11 : vector<1x8x1xf32> to vector<2x8x16xf32>
    %13 = vector.broadcast %8 : vector<2x1x16xf32> to vector<2x8x16xf32>
    %14 = arith.mulf %12, %13 : vector<2x8x16xf32>
    %15 = arith.addf %7, %14 : vector<2x8x16xf32>
    %c0_7 = arith.constant 0 : index
    %c0_8 = arith.constant 0 : index
    %c2 = arith.constant 2 : index
    %16 = vector.load %arg1[%c0_7, %c0_8, %c2] : memref<2x4x18xf32, #tpu.memory_space<vmem>>, vector<2x1x16xf32>
    %17 = vector.extract_strided_slice %0 {offsets = [2, 0, 0], sizes = [1, 8, 1], strides = [1, 1, 1]} : vector<12x8x1xf32> to vector<1x8x1xf32>
    %18 = vector.shape_cast %17 : vector<1x8x1xf32> to vector<8x1xf32>
    %19 = vector.shape_cast %18 : vector<8x1xf32> to vector<1x8x1xf32>
    %20 = vector.broadcast %19 : vector<1x8x1xf32> to vector<2x8x16xf32>
    %21 = vector.broadcast %16 : vector<2x1x16xf32> to vector<2x8x16xf32>
    %22 = arith.mulf %20, %21 : vector<2x8x16xf32>
    %23 = arith.addf %15, %22 : vector<2x8x16xf32>
    %c0_9 = arith.constant 0 : index
    %c1_10 = arith.constant 1 : index
    %c0_11 = arith.constant 0 : index
    %24 = vector.load %arg1[%c0_9, %c1_10, %c0_11] : memref<2x4x18xf32, #tpu.memory_space<vmem>>, vector<2x1x16xf32>
    %25 = vector.extract_strided_slice %0 {offsets = [3, 0, 0], sizes = [1, 8, 1], strides = [1, 1, 1]} : vector<12x8x1xf32> to vector<1x8x1xf32>
    %26 = vector.shape_cast %25 : vector<1x8x1xf32> to vector<8x1xf32>
    %27 = vector.shape_cast %26 : vector<8x1xf32> to vector<1x8x1xf32>
    %28 = vector.broadcast %27 : vector<1x8x1xf32> to vector<2x8x16xf32>
    %29 = vector.broadcast %24 : vector<2x1x16xf32> to vector<2x8x16xf32>
    %30 = arith.mulf %28, %29 : vector<2x8x16xf32>
    %31 = arith.addf %23, %30 : vector<2x8x16xf32>
    %c0_12 = arith.constant 0 : index
    %c1_13 = arith.constant 1 : index
    %c1_14 = arith.constant 1 : index
    %32 = vector.load %arg1[%c0_12, %c1_13, %c1_14] : memref<2x4x18xf32, #tpu.memory_space<vmem>>, vector<2x1x16xf32>
    %33 = vector.extract_strided_slice %0 {offsets = [4, 0, 0], sizes = [1, 8, 1], strides = [1, 1, 1]} : vector<12x8x1xf32> to vector<1x8x1xf32>
    %34 = vector.shape_cast %33 : vector<1x8x1xf32> to vector<8x1xf32>
    %35 = vector.shape_cast %34 : vector<8x1xf32> to vector<1x8x1xf32>
    %36 = vector.broadcast %35 : vector<1x8x1xf32> to vector<2x8x16xf32>
    %37 = vector.broadcast %32 : vector<2x1x16xf32> to vector<2x8x16xf32>
    %38 = arith.mulf %36, %37 : vector<2x8x16xf32>
    %39 = arith.addf %31, %38 : vector<2x8x16xf32>
    %c0_15 = arith.constant 0 : index
    %c1_16 = arith.constant 1 : index
    %c2_17 = arith.constant 2 : index
    %40 = vector.load %arg1[%c0_15, %c1_16, %c2_17] : memref<2x4x18xf32, #tpu.memory_space<vmem>>, vector<2x1x16xf32>
    %41 = vector.extract_strided_slice %0 {offsets = [5, 0, 0], sizes = [1, 8, 1], strides = [1, 1, 1]} : vector<12x8x1xf32> to vector<1x8x1xf32>
    %42 = vector.shape_cast %41 : vector<1x8x1xf32> to vector<8x1xf32>
    %43 = vector.shape_cast %42 : vector<8x1xf32> to vector<1x8x1xf32>
    %44 = vector.broadcast %43 : vector<1x8x1xf32> to vector<2x8x16xf32>
    %45 = vector.broadcast %40 : vector<2x1x16xf32> to vector<2x8x16xf32>
    %46 = arith.mulf %44, %45 : vector<2x8x16xf32>
    %47 = arith.addf %39, %46 : vector<2x8x16xf32>
    %c0_18 = arith.constant 0 : index
    %c2_19 = arith.constant 2 : index
    %c0_20 = arith.constant 0 : index
    %48 = vector.load %arg1[%c0_18, %c2_19, %c0_20] : memref<2x4x18xf32, #tpu.memory_space<vmem>>, vector<2x1x16xf32>
    %49 = vector.extract_strided_slice %0 {offsets = [6, 0, 0], sizes = [1, 8, 1], strides = [1, 1, 1]} : vector<12x8x1xf32> to vector<1x8x1xf32>
    %50 = vector.shape_cast %49 : vector<1x8x1xf32> to vector<8x1xf32>
    %51 = vector.shape_cast %50 : vector<8x1xf32> to vector<1x8x1xf32>
    %52 = vector.broadcast %51 : vector<1x8x1xf32> to vector<2x8x16xf32>
    %53 = vector.broadcast %48 : vector<2x1x16xf32> to vector<2x8x16xf32>
    %54 = arith.mulf %52, %53 : vector<2x8x16xf32>
    %55 = arith.addf %47, %54 : vector<2x8x16xf32>
    %c0_21 = arith.constant 0 : index
    %c2_22 = arith.constant 2 : index
    %c1_23 = arith.constant 1 : index
    %56 = vector.load %arg1[%c0_21, %c2_22, %c1_23] : memref<2x4x18xf32, #tpu.memory_space<vmem>>, vector<2x1x16xf32>
    %57 = vector.extract_strided_slice %0 {offsets = [7, 0, 0], sizes = [1, 8, 1], strides = [1, 1, 1]} : vector<12x8x1xf32> to vector<1x8x1xf32>
    %58 = vector.shape_cast %57 : vector<1x8x1xf32> to vector<8x1xf32>
    %59 = vector.shape_cast %58 : vector<8x1xf32> to vector<1x8x1xf32>
    %60 = vector.broadcast %59 : vector<1x8x1xf32> to vector<2x8x16xf32>
    %61 = vector.broadcast %56 : vector<2x1x16xf32> to vector<2x8x16xf32>
    %62 = arith.mulf %60, %61 : vector<2x8x16xf32>
    %63 = arith.addf %55, %62 : vector<2x8x16xf32>
    %c0_24 = arith.constant 0 : index
    %c2_25 = arith.constant 2 : index
    %c2_26 = arith.constant 2 : index
    %64 = vector.load %arg1[%c0_24, %c2_25, %c2_26] : memref<2x4x18xf32, #tpu.memory_space<vmem>>, vector<2x1x16xf32>
    %65 = vector.extract_strided_slice %0 {offsets = [8, 0, 0], sizes = [1, 8, 1], strides = [1, 1, 1]} : vector<12x8x1xf32> to vector<1x8x1xf32>
    %66 = vector.shape_cast %65 : vector<1x8x1xf32> to vector<8x1xf32>
    %67 = vector.shape_cast %66 : vector<8x1xf32> to vector<1x8x1xf32>
    %68 = vector.broadcast %67 : vector<1x8x1xf32> to vector<2x8x16xf32>
    %69 = vector.broadcast %64 : vector<2x1x16xf32> to vector<2x8x16xf32>
    %70 = arith.mulf %68, %69 : vector<2x8x16xf32>
    %71 = arith.addf %63, %70 : vector<2x8x16xf32>
    %c0_27 = arith.constant 0 : index
    %c3 = arith.constant 3 : index
    %c0_28 = arith.constant 0 : index
    %72 = vector.load %arg1[%c0_27, %c3, %c0_28] : memref<2x4x18xf32, #tpu.memory_space<vmem>>, vector<2x1x16xf32>
    %73 = vector.extract_strided_slice %0 {offsets = [9, 0, 0], sizes = [1, 8, 1], strides = [1, 1, 1]} : vector<12x8x1xf32> to vector<1x8x1xf32>
    %74 = vector.shape_cast %73 : vector<1x8x1xf32> to vector<8x1xf32>
    %75 = vector.shape_cast %74 : vector<8x1xf32> to vector<1x8x1xf32>
    %76 = vector.broadcast %75 : vector<1x8x1xf32> to vector<2x8x16xf32>
    %77 = vector.broadcast %72 : vector<2x1x16xf32> to vector<2x8x16xf32>
    %78 = arith.mulf %76, %77 : vector<2x8x16xf32>
    %79 = arith.addf %71, %78 : vector<2x8x16xf32>
    %c0_29 = arith.constant 0 : index
    %c3_30 = arith.constant 3 : index
    %c1_31 = arith.constant 1 : index
    %80 = vector.load %arg1[%c0_29, %c3_30, %c1_31] : memref<2x4x18xf32, #tpu.memory_space<vmem>>, vector<2x1x16xf32>
    %81 = vector.extract_strided_slice %0 {offsets = [10, 0, 0], sizes = [1, 8, 1], strides = [1, 1, 1]} : vector<12x8x1xf32> to vector<1x8x1xf32>
    %82 = vector.shape_cast %81 : vector<1x8x1xf32> to vector<8x1xf32>
    %83 = vector.shape_cast %82 : vector<8x1xf32> to vector<1x8x1xf32>
    %84 = vector.broadcast %83 : vector<1x8x1xf32> to vector<2x8x16xf32>
    %85 = vector.broadcast %80 : vector<2x1x16xf32> to vector<2x8x16xf32>
    %86 = arith.mulf %84, %85 : vector<2x8x16xf32>
    %87 = arith.addf %79, %86 : vector<2x8x16xf32>
    %c0_32 = arith.constant 0 : index
    %c3_33 = arith.constant 3 : index
    %c2_34 = arith.constant 2 : index
    %88 = vector.load %arg1[%c0_32, %c3_33, %c2_34] : memref<2x4x18xf32, #tpu.memory_space<vmem>>, vector<2x1x16xf32>
    %89 = vector.extract_strided_slice %0 {offsets = [11, 0, 0], sizes = [1, 8, 1], strides = [1, 1, 1]} : vector<12x8x1xf32> to vector<1x8x1xf32>
    %90 = vector.shape_cast %89 : vector<1x8x1xf32> to vector<8x1xf32>
    %91 = vector.shape_cast %90 : vector<8x1xf32> to vector<1x8x1xf32>
    %92 = vector.broadcast %91 : vector<1x8x1xf32> to vector<2x8x16xf32>
    %93 = vector.broadcast %88 : vector<2x1x16xf32> to vector<2x8x16xf32>
    %94 = arith.mulf %92, %93 : vector<2x8x16xf32>
    %95 = arith.addf %87, %94 : vector<2x8x16xf32>
    %cst = arith.constant dense<0.000000e+00> : vector<8xf32>
    %96 = vector.multi_reduction <add>, %95, %cst [0, 2] : vector<2x8x16xf32> to vector<8xf32>
    %97 = vector.shape_cast %96 : vector<8xf32> to vector<1x8x1xf32>
    %98 = arith.mulf %95, %95 : vector<2x8x16xf32>
    %cst_35 = arith.constant dense<0.000000e+00> : vector<8xf32>
    %99 = vector.multi_reduction <add>, %98, %cst_35 [0, 2] : vector<2x8x16xf32> to vector<8xf32>
    %100 = vector.shape_cast %99 : vector<8xf32> to vector<1x8x1xf32>
    %cst_36 = arith.constant 3.125000e-02 : f32
    %101 = vector.broadcast %cst_36 : f32 to vector<1x8x1xf32>
    %102 = arith.mulf %97, %101 : vector<1x8x1xf32>
    %cst_37 = arith.constant 3.125000e-02 : f32
    %103 = vector.broadcast %cst_37 : f32 to vector<1x8x1xf32>
    %104 = arith.mulf %100, %103 : vector<1x8x1xf32>
    %105 = arith.mulf %102, %102 : vector<1x8x1xf32>
    %106 = arith.subf %104, %105 : vector<1x8x1xf32>
    %c0_38 = arith.constant 0 : index
    %c0_39 = arith.constant 0 : index
    %107 = vector.load %arg3[%c0_38, %c0_39] : memref<8x1xf32, #tpu.memory_space<vmem>>, vector<8x1xf32>
    %108 = vector.shape_cast %107 : vector<8x1xf32> to vector<1x8x1xf32>
    %cst_40 = arith.constant 9.99999974E-6 : f32
    %109 = vector.broadcast %cst_40 : f32 to vector<1x8x1xf32>
    %110 = arith.addf %106, %109 : vector<1x8x1xf32>
    %111 = math.rsqrt %110 : vector<1x8x1xf32>
    %112 = arith.mulf %108, %111 : vector<1x8x1xf32>
    %c0_41 = arith.constant 0 : index
    %c0_42 = arith.constant 0 : index
    %113 = vector.load %arg4[%c0_41, %c0_42] : memref<8x1xf32, #tpu.memory_space<vmem>>, vector<8x1xf32>
    %114 = vector.shape_cast %113 : vector<8x1xf32> to vector<1x8x1xf32>
    %115 = arith.mulf %102, %112 : vector<1x8x1xf32>
    %116 = arith.subf %114, %115 : vector<1x8x1xf32>
    %117 = vector.broadcast %112 : vector<1x8x1xf32> to vector<2x8x16xf32>
    %118 = arith.mulf %95, %117 : vector<2x8x16xf32>
    %119 = vector.broadcast %116 : vector<1x8x1xf32> to vector<2x8x16xf32>
    %120 = arith.addf %118, %119 : vector<2x8x16xf32>
    %cst_43 = arith.constant 0.000000e+00 : f32
    %121 = vector.broadcast %cst_43 : f32 to vector<2x8x16xf32>
    %122 = arith.maximumf %120, %121 : vector<2x8x16xf32>
    %cst_44 = arith.constant 0.000000e+00 : f32
    %123 = vector.broadcast %cst_44 : f32 to vector<2x8x1xf32>
    %c0_45 = arith.constant 0 : index
    %c0_46 = arith.constant 0 : index
    %c0_47 = arith.constant 0 : index
    %124 = vector.load %arg9[%c0_45, %c0_46, %c0_47] : memref<2x8x18xf32, #tpu.memory_space<vmem>>, vector<2x8x1xf32>
    tpu.vector_store %arg9[%c0_45, %c0_46, %c0_47], %123 {strides = array<i32>} : memref<2x8x18xf32, #tpu.memory_space<vmem>>, vector<2x8x1xf32>,
    %cst_48 = arith.constant 0.000000e+00 : f32
    %125 = vector.broadcast %cst_48 : f32 to vector<2x8x1xf32>
    %c0_49 = arith.constant 0 : index
    %c0_50 = arith.constant 0 : index
    %c17 = arith.constant 17 : index
    %126 = vector.load %arg9[%c0_49, %c0_50, %c17] : memref<2x8x18xf32, #tpu.memory_space<vmem>>, vector<2x8x1xf32>
    tpu.vector_store %arg9[%c0_49, %c0_50, %c17], %125 {strides = array<i32>} : memref<2x8x18xf32, #tpu.memory_space<vmem>>, vector<2x8x1xf32>,
    %c0_51 = arith.constant 0 : index
    %c0_52 = arith.constant 0 : index
    %c1_53 = arith.constant 1 : index
    %127 = vector.load %arg9[%c0_51, %c0_52, %c1_53] : memref<2x8x18xf32, #tpu.memory_space<vmem>>, vector<2x8x16xf32>
    tpu.vector_store %arg9[%c0_51, %c0_52, %c1_53], %122 {strides = array<i32>} : memref<2x8x18xf32, #tpu.memory_space<vmem>>, vector<2x8x16xf32>,
    %c0_54 = arith.constant 0 : index
    %c0_55 = arith.constant 0 : index
    %c0_56 = arith.constant 0 : index
    %128 = vector.load %arg5[%c0_54, %c0_55, %c0_56] : memref<24x8x1xf32, #tpu.memory_space<vmem>>, vector<24x8x1xf32>
    %c0_57 = arith.constant 0 : index
    %c0_58 = arith.constant 0 : index
    %c0_59 = arith.constant 0 : index
    %129 = vector.load %arg9[%c0_57, %c0_58, %c0_59] : memref<2x8x18xf32, #tpu.memory_space<vmem>>, vector<2x1x16xf32>
    %130 = vector.extract_strided_slice %128 {offsets = [0, 0, 0], sizes = [1, 8, 1], strides = [1, 1, 1]} : vector<24x8x1xf32> to vector<1x8x1xf32>
    %131 = vector.shape_cast %130 : vector<1x8x1xf32> to vector<8x1xf32>
    %132 = vector.shape_cast %131 : vector<8x1xf32> to vector<1x8x1xf32>
    %133 = vector.broadcast %132 : vector<1x8x1xf32> to vector<2x8x16xf32>
    %134 = vector.broadcast %129 : vector<2x1x16xf32> to vector<2x8x16xf32>
    %135 = arith.mulf %133, %134 : vector<2x8x16xf32>
    %c0_60 = arith.constant 0 : index
    %c0_61 = arith.constant 0 : index
    %c1_62 = arith.constant 1 : index
    %136 = vector.load %arg9[%c0_60, %c0_61, %c1_62] : memref<2x8x18xf32, #tpu.memory_space<vmem>>, vector<2x1x16xf32>
    %137 = vector.extract_strided_slice %128 {offsets = [1, 0, 0], sizes = [1, 8, 1], strides = [1, 1, 1]} : vector<24x8x1xf32> to vector<1x8x1xf32>
    %138 = vector.shape_cast %137 : vector<1x8x1xf32> to vector<8x1xf32>
    %139 = vector.shape_cast %138 : vector<8x1xf32> to vector<1x8x1xf32>
    %140 = vector.broadcast %139 : vector<1x8x1xf32> to vector<2x8x16xf32>
    %141 = vector.broadcast %136 : vector<2x1x16xf32> to vector<2x8x16xf32>
    %142 = arith.mulf %140, %141 : vector<2x8x16xf32>
    %143 = arith.addf %135, %142 : vector<2x8x16xf32>
    %c0_63 = arith.constant 0 : index
    %c0_64 = arith.constant 0 : index
    %c2_65 = arith.constant 2 : index
    %144 = vector.load %arg9[%c0_63, %c0_64, %c2_65] : memref<2x8x18xf32, #tpu.memory_space<vmem>>, vector<2x1x16xf32>
    %145 = vector.extract_strided_slice %128 {offsets = [2, 0, 0], sizes = [1, 8, 1], strides = [1, 1, 1]} : vector<24x8x1xf32> to vector<1x8x1xf32>
    %146 = vector.shape_cast %145 : vector<1x8x1xf32> to vector<8x1xf32>
    %147 = vector.shape_cast %146 : vector<8x1xf32> to vector<1x8x1xf32>
    %148 = vector.broadcast %147 : vector<1x8x1xf32> to vector<2x8x16xf32>
    %149 = vector.broadcast %144 : vector<2x1x16xf32> to vector<2x8x16xf32>
    %150 = arith.mulf %148, %149 : vector<2x8x16xf32>
    %151 = arith.addf %143, %150 : vector<2x8x16xf32>
    %c0_66 = arith.constant 0 : index
    %c1_67 = arith.constant 1 : index
    %c0_68 = arith.constant 0 : index
    %152 = vector.load %arg9[%c0_66, %c1_67, %c0_68] : memref<2x8x18xf32, #tpu.memory_space<vmem>>, vector<2x1x16xf32>
    %153 = vector.extract_strided_slice %128 {offsets = [3, 0, 0], sizes = [1, 8, 1], strides = [1, 1, 1]} : vector<24x8x1xf32> to vector<1x8x1xf32>
    %154 = vector.shape_cast %153 : vector<1x8x1xf32> to vector<8x1xf32>
    %155 = vector.shape_cast %154 : vector<8x1xf32> to vector<1x8x1xf32>
    %156 = vector.broadcast %155 : vector<1x8x1xf32> to vector<2x8x16xf32>
    %157 = vector.broadcast %152 : vector<2x1x16xf32> to vector<2x8x16xf32>
    %158 = arith.mulf %156, %157 : vector<2x8x16xf32>
    %159 = arith.addf %151, %158 : vector<2x8x16xf32>
    %c0_69 = arith.constant 0 : index
    %c1_70 = arith.constant 1 : index
    %c1_71 = arith.constant 1 : index
    %160 = vector.load %arg9[%c0_69, %c1_70, %c1_71] : memref<2x8x18xf32, #tpu.memory_space<vmem>>, vector<2x1x16xf32>
    %161 = vector.extract_strided_slice %128 {offsets = [4, 0, 0], sizes = [1, 8, 1], strides = [1, 1, 1]} : vector<24x8x1xf32> to vector<1x8x1xf32>
    %162 = vector.shape_cast %161 : vector<1x8x1xf32> to vector<8x1xf32>
    %163 = vector.shape_cast %162 : vector<8x1xf32> to vector<1x8x1xf32>
    %164 = vector.broadcast %163 : vector<1x8x1xf32> to vector<2x8x16xf32>
    %165 = vector.broadcast %160 : vector<2x1x16xf32> to vector<2x8x16xf32>
    %166 = arith.mulf %164, %165 : vector<2x8x16xf32>
    %167 = arith.addf %159, %166 : vector<2x8x16xf32>
    %c0_72 = arith.constant 0 : index
    %c1_73 = arith.constant 1 : index
    %c2_74 = arith.constant 2 : index
    %168 = vector.load %arg9[%c0_72, %c1_73, %c2_74] : memref<2x8x18xf32, #tpu.memory_space<vmem>>, vector<2x1x16xf32>
    %169 = vector.extract_strided_slice %128 {offsets = [5, 0, 0], sizes = [1, 8, 1], strides = [1, 1, 1]} : vector<24x8x1xf32> to vector<1x8x1xf32>
    %170 = vector.shape_cast %169 : vector<1x8x1xf32> to vector<8x1xf32>
    %171 = vector.shape_cast %170 : vector<8x1xf32> to vector<1x8x1xf32>
    %172 = vector.broadcast %171 : vector<1x8x1xf32> to vector<2x8x16xf32>
    %173 = vector.broadcast %168 : vector<2x1x16xf32> to vector<2x8x16xf32>
    %174 = arith.mulf %172, %173 : vector<2x8x16xf32>
    %175 = arith.addf %167, %174 : vector<2x8x16xf32>
    %c0_75 = arith.constant 0 : index
    %c2_76 = arith.constant 2 : index
    %c0_77 = arith.constant 0 : index
    %176 = vector.load %arg9[%c0_75, %c2_76, %c0_77] : memref<2x8x18xf32, #tpu.memory_space<vmem>>, vector<2x1x16xf32>
    %177 = vector.extract_strided_slice %128 {offsets = [6, 0, 0], sizes = [1, 8, 1], strides = [1, 1, 1]} : vector<24x8x1xf32> to vector<1x8x1xf32>
    %178 = vector.shape_cast %177 : vector<1x8x1xf32> to vector<8x1xf32>
    %179 = vector.shape_cast %178 : vector<8x1xf32> to vector<1x8x1xf32>
    %180 = vector.broadcast %179 : vector<1x8x1xf32> to vector<2x8x16xf32>
    %181 = vector.broadcast %176 : vector<2x1x16xf32> to vector<2x8x16xf32>
    %182 = arith.mulf %180, %181 : vector<2x8x16xf32>
    %183 = arith.addf %175, %182 : vector<2x8x16xf32>
    %c0_78 = arith.constant 0 : index
    %c2_79 = arith.constant 2 : index
    %c1_80 = arith.constant 1 : index
    %184 = vector.load %arg9[%c0_78, %c2_79, %c1_80] : memref<2x8x18xf32, #tpu.memory_space<vmem>>, vector<2x1x16xf32>
    %185 = vector.extract_strided_slice %128 {offsets = [7, 0, 0], sizes = [1, 8, 1], strides = [1, 1, 1]} : vector<24x8x1xf32> to vector<1x8x1xf32>
    %186 = vector.shape_cast %185 : vector<1x8x1xf32> to vector<8x1xf32>
    %187 = vector.shape_cast %186 : vector<8x1xf32> to vector<1x8x1xf32>
    %188 = vector.broadcast %187 : vector<1x8x1xf32> to vector<2x8x16xf32>
    %189 = vector.broadcast %184 : vector<2x1x16xf32> to vector<2x8x16xf32>
    %190 = arith.mulf %188, %189 : vector<2x8x16xf32>
    %191 = arith.addf %183, %190 : vector<2x8x16xf32>
    %c0_81 = arith.constant 0 : index
    %c2_82 = arith.constant 2 : index
    %c2_83 = arith.constant 2 : index
    %192 = vector.load %arg9[%c0_81, %c2_82, %c2_83] : memref<2x8x18xf32, #tpu.memory_space<vmem>>, vector<2x1x16xf32>
    %193 = vector.extract_strided_slice %128 {offsets = [8, 0, 0], sizes = [1, 8, 1], strides = [1, 1, 1]} : vector<24x8x1xf32> to vector<1x8x1xf32>
    %194 = vector.shape_cast %193 : vector<1x8x1xf32> to vector<8x1xf32>
    %195 = vector.shape_cast %194 : vector<8x1xf32> to vector<1x8x1xf32>
    %196 = vector.broadcast %195 : vector<1x8x1xf32> to vector<2x8x16xf32>
    %197 = vector.broadcast %192 : vector<2x1x16xf32> to vector<2x8x16xf32>
    %198 = arith.mulf %196, %197 : vector<2x8x16xf32>
    %199 = arith.addf %191, %198 : vector<2x8x16xf32>
    %c0_84 = arith.constant 0 : index
    %c3_85 = arith.constant 3 : index
    %c0_86 = arith.constant 0 : index
    %200 = vector.load %arg9[%c0_84, %c3_85, %c0_86] : memref<2x8x18xf32, #tpu.memory_space<vmem>>, vector<2x1x16xf32>
    %201 = vector.extract_strided_slice %128 {offsets = [9, 0, 0], sizes = [1, 8, 1], strides = [1, 1, 1]} : vector<24x8x1xf32> to vector<1x8x1xf32>
    %202 = vector.shape_cast %201 : vector<1x8x1xf32> to vector<8x1xf32>
    %203 = vector.shape_cast %202 : vector<8x1xf32> to vector<1x8x1xf32>
    %204 = vector.broadcast %203 : vector<1x8x1xf32> to vector<2x8x16xf32>
    %205 = vector.broadcast %200 : vector<2x1x16xf32> to vector<2x8x16xf32>
    %206 = arith.mulf %204, %205 : vector<2x8x16xf32>
    %207 = arith.addf %199, %206 : vector<2x8x16xf32>
    %c0_87 = arith.constant 0 : index
    %c3_88 = arith.constant 3 : index
    %c1_89 = arith.constant 1 : index
    %208 = vector.load %arg9[%c0_87, %c3_88, %c1_89] : memref<2x8x18xf32, #tpu.memory_space<vmem>>, vector<2x1x16xf32>
    %209 = vector.extract_strided_slice %128 {offsets = [10, 0, 0], sizes = [1, 8, 1], strides = [1, 1, 1]} : vector<24x8x1xf32> to vector<1x8x1xf32>
    %210 = vector.shape_cast %209 : vector<1x8x1xf32> to vector<8x1xf32>
    %211 = vector.shape_cast %210 : vector<8x1xf32> to vector<1x8x1xf32>
    %212 = vector.broadcast %211 : vector<1x8x1xf32> to vector<2x8x16xf32>
    %213 = vector.broadcast %208 : vector<2x1x16xf32> to vector<2x8x16xf32>
    %214 = arith.mulf %212, %213 : vector<2x8x16xf32>
    %215 = arith.addf %207, %214 : vector<2x8x16xf32>
    %c0_90 = arith.constant 0 : index
    %c3_91 = arith.constant 3 : index
    %c2_92 = arith.constant 2 : index
    %216 = vector.load %arg9[%c0_90, %c3_91, %c2_92] : memref<2x8x18xf32, #tpu.memory_space<vmem>>, vector<2x1x16xf32>
    %217 = vector.extract_strided_slice %128 {offsets = [11, 0, 0], sizes = [1, 8, 1], strides = [1, 1, 1]} : vector<24x8x1xf32> to vector<1x8x1xf32>
    %218 = vector.shape_cast %217 : vector<1x8x1xf32> to vector<8x1xf32>
    %219 = vector.shape_cast %218 : vector<8x1xf32> to vector<1x8x1xf32>
    %220 = vector.broadcast %219 : vector<1x8x1xf32> to vector<2x8x16xf32>
    %221 = vector.broadcast %216 : vector<2x1x16xf32> to vector<2x8x16xf32>
    %222 = arith.mulf %220, %221 : vector<2x8x16xf32>
    %223 = arith.addf %215, %222 : vector<2x8x16xf32>
    %c0_93 = arith.constant 0 : index
    %c4 = arith.constant 4 : index
    %c0_94 = arith.constant 0 : index
    %224 = vector.load %arg9[%c0_93, %c4, %c0_94] : memref<2x8x18xf32, #tpu.memory_space<vmem>>, vector<2x1x16xf32>
    %225 = vector.extract_strided_slice %128 {offsets = [12, 0, 0], sizes = [1, 8, 1], strides = [1, 1, 1]} : vector<24x8x1xf32> to vector<1x8x1xf32>
    %226 = vector.shape_cast %225 : vector<1x8x1xf32> to vector<8x1xf32>
    %227 = vector.shape_cast %226 : vector<8x1xf32> to vector<1x8x1xf32>
    %228 = vector.broadcast %227 : vector<1x8x1xf32> to vector<2x8x16xf32>
    %229 = vector.broadcast %224 : vector<2x1x16xf32> to vector<2x8x16xf32>
    %230 = arith.mulf %228, %229 : vector<2x8x16xf32>
    %231 = arith.addf %223, %230 : vector<2x8x16xf32>
    %c0_95 = arith.constant 0 : index
    %c4_96 = arith.constant 4 : index
    %c1_97 = arith.constant 1 : index
    %232 = vector.load %arg9[%c0_95, %c4_96, %c1_97] : memref<2x8x18xf32, #tpu.memory_space<vmem>>, vector<2x1x16xf32>
    %233 = vector.extract_strided_slice %128 {offsets = [13, 0, 0], sizes = [1, 8, 1], strides = [1, 1, 1]} : vector<24x8x1xf32> to vector<1x8x1xf32>
    %234 = vector.shape_cast %233 : vector<1x8x1xf32> to vector<8x1xf32>
    %235 = vector.shape_cast %234 : vector<8x1xf32> to vector<1x8x1xf32>
    %236 = vector.broadcast %235 : vector<1x8x1xf32> to vector<2x8x16xf32>
    %237 = vector.broadcast %232 : vector<2x1x16xf32> to vector<2x8x16xf32>
    %238 = arith.mulf %236, %237 : vector<2x8x16xf32>
    %239 = arith.addf %231, %238 : vector<2x8x16xf32>
    %c0_98 = arith.constant 0 : index
    %c4_99 = arith.constant 4 : index
    %c2_100 = arith.constant 2 : index
    %240 = vector.load %arg9[%c0_98, %c4_99, %c2_100] : memref<2x8x18xf32, #tpu.memory_space<vmem>>, vector<2x1x16xf32>
    %241 = vector.extract_strided_slice %128 {offsets = [14, 0, 0], sizes = [1, 8, 1], strides = [1, 1, 1]} : vector<24x8x1xf32> to vector<1x8x1xf32>
    %242 = vector.shape_cast %241 : vector<1x8x1xf32> to vector<8x1xf32>
    %243 = vector.shape_cast %242 : vector<8x1xf32> to vector<1x8x1xf32>
    %244 = vector.broadcast %243 : vector<1x8x1xf32> to vector<2x8x16xf32>
    %245 = vector.broadcast %240 : vector<2x1x16xf32> to vector<2x8x16xf32>
    %246 = arith.mulf %244, %245 : vector<2x8x16xf32>
    %247 = arith.addf %239, %246 : vector<2x8x16xf32>
    %c0_101 = arith.constant 0 : index
    %c5 = arith.constant 5 : index
    %c0_102 = arith.constant 0 : index
    %248 = vector.load %arg9[%c0_101, %c5, %c0_102] : memref<2x8x18xf32, #tpu.memory_space<vmem>>, vector<2x1x16xf32>
    %249 = vector.extract_strided_slice %128 {offsets = [15, 0, 0], sizes = [1, 8, 1], strides = [1, 1, 1]} : vector<24x8x1xf32> to vector<1x8x1xf32>
    %250 = vector.shape_cast %249 : vector<1x8x1xf32> to vector<8x1xf32>
    %251 = vector.shape_cast %250 : vector<8x1xf32> to vector<1x8x1xf32>
    %252 = vector.broadcast %251 : vector<1x8x1xf32> to vector<2x8x16xf32>
    %253 = vector.broadcast %248 : vector<2x1x16xf32> to vector<2x8x16xf32>
    %254 = arith.mulf %252, %253 : vector<2x8x16xf32>
    %255 = arith.addf %247, %254 : vector<2x8x16xf32>
    %c0_103 = arith.constant 0 : index
    %c5_104 = arith.constant 5 : index
    %c1_105 = arith.constant 1 : index
    %256 = vector.load %arg9[%c0_103, %c5_104, %c1_105] : memref<2x8x18xf32, #tpu.memory_space<vmem>>, vector<2x1x16xf32>
    %257 = vector.extract_strided_slice %128 {offsets = [16, 0, 0], sizes = [1, 8, 1], strides = [1, 1, 1]} : vector<24x8x1xf32> to vector<1x8x1xf32>
    %258 = vector.shape_cast %257 : vector<1x8x1xf32> to vector<8x1xf32>
    %259 = vector.shape_cast %258 : vector<8x1xf32> to vector<1x8x1xf32>
    %260 = vector.broadcast %259 : vector<1x8x1xf32> to vector<2x8x16xf32>
    %261 = vector.broadcast %256 : vector<2x1x16xf32> to vector<2x8x16xf32>
    %262 = arith.mulf %260, %261 : vector<2x8x16xf32>
    %263 = arith.addf %255, %262 : vector<2x8x16xf32>
    %c0_106 = arith.constant 0 : index
    %c5_107 = arith.constant 5 : index
    %c2_108 = arith.constant 2 : index
    %264 = vector.load %arg9[%c0_106, %c5_107, %c2_108] : memref<2x8x18xf32, #tpu.memory_space<vmem>>, vector<2x1x16xf32>
    %265 = vector.extract_strided_slice %128 {offsets = [17, 0, 0], sizes = [1, 8, 1], strides = [1, 1, 1]} : vector<24x8x1xf32> to vector<1x8x1xf32>
    %266 = vector.shape_cast %265 : vector<1x8x1xf32> to vector<8x1xf32>
    %267 = vector.shape_cast %266 : vector<8x1xf32> to vector<1x8x1xf32>
    %268 = vector.broadcast %267 : vector<1x8x1xf32> to vector<2x8x16xf32>
    %269 = vector.broadcast %264 : vector<2x1x16xf32> to vector<2x8x16xf32>
    %270 = arith.mulf %268, %269 : vector<2x8x16xf32>
    %271 = arith.addf %263, %270 : vector<2x8x16xf32>
    %c0_109 = arith.constant 0 : index
    %c6 = arith.constant 6 : index
    %c0_110 = arith.constant 0 : index
    %272 = vector.load %arg9[%c0_109, %c6, %c0_110] : memref<2x8x18xf32, #tpu.memory_space<vmem>>, vector<2x1x16xf32>
    %273 = vector.extract_strided_slice %128 {offsets = [18, 0, 0], sizes = [1, 8, 1], strides = [1, 1, 1]} : vector<24x8x1xf32> to vector<1x8x1xf32>
    %274 = vector.shape_cast %273 : vector<1x8x1xf32> to vector<8x1xf32>
    %275 = vector.shape_cast %274 : vector<8x1xf32> to vector<1x8x1xf32>
    %276 = vector.broadcast %275 : vector<1x8x1xf32> to vector<2x8x16xf32>
    %277 = vector.broadcast %272 : vector<2x1x16xf32> to vector<2x8x16xf32>
    %278 = arith.mulf %276, %277 : vector<2x8x16xf32>
    %279 = arith.addf %271, %278 : vector<2x8x16xf32>
    %c0_111 = arith.constant 0 : index
    %c6_112 = arith.constant 6 : index
    %c1_113 = arith.constant 1 : index
    %280 = vector.load %arg9[%c0_111, %c6_112, %c1_113] : memref<2x8x18xf32, #tpu.memory_space<vmem>>, vector<2x1x16xf32>
    %281 = vector.extract_strided_slice %128 {offsets = [19, 0, 0], sizes = [1, 8, 1], strides = [1, 1, 1]} : vector<24x8x1xf32> to vector<1x8x1xf32>
    %282 = vector.shape_cast %281 : vector<1x8x1xf32> to vector<8x1xf32>
    %283 = vector.shape_cast %282 : vector<8x1xf32> to vector<1x8x1xf32>
    %284 = vector.broadcast %283 : vector<1x8x1xf32> to vector<2x8x16xf32>
    %285 = vector.broadcast %280 : vector<2x1x16xf32> to vector<2x8x16xf32>
    %286 = arith.mulf %284, %285 : vector<2x8x16xf32>
    %287 = arith.addf %279, %286 : vector<2x8x16xf32>
    %c0_114 = arith.constant 0 : index
    %c6_115 = arith.constant 6 : index
    %c2_116 = arith.constant 2 : index
    %288 = vector.load %arg9[%c0_114, %c6_115, %c2_116] : memref<2x8x18xf32, #tpu.memory_space<vmem>>, vector<2x1x16xf32>
    %289 = vector.extract_strided_slice %128 {offsets = [20, 0, 0], sizes = [1, 8, 1], strides = [1, 1, 1]} : vector<24x8x1xf32> to vector<1x8x1xf32>
    %290 = vector.shape_cast %289 : vector<1x8x1xf32> to vector<8x1xf32>
    %291 = vector.shape_cast %290 : vector<8x1xf32> to vector<1x8x1xf32>
    %292 = vector.broadcast %291 : vector<1x8x1xf32> to vector<2x8x16xf32>
    %293 = vector.broadcast %288 : vector<2x1x16xf32> to vector<2x8x16xf32>
    %294 = arith.mulf %292, %293 : vector<2x8x16xf32>
    %295 = arith.addf %287, %294 : vector<2x8x16xf32>
    %c0_117 = arith.constant 0 : index
    %c7 = arith.constant 7 : index
    %c0_118 = arith.constant 0 : index
    %296 = vector.load %arg9[%c0_117, %c7, %c0_118] : memref<2x8x18xf32, #tpu.memory_space<vmem>>, vector<2x1x16xf32>
    %297 = vector.extract_strided_slice %128 {offsets = [21, 0, 0], sizes = [1, 8, 1], strides = [1, 1, 1]} : vector<24x8x1xf32> to vector<1x8x1xf32>
    %298 = vector.shape_cast %297 : vector<1x8x1xf32> to vector<8x1xf32>
    %299 = vector.shape_cast %298 : vector<8x1xf32> to vector<1x8x1xf32>
    %300 = vector.broadcast %299 : vector<1x8x1xf32> to vector<2x8x16xf32>
    %301 = vector.broadcast %296 : vector<2x1x16xf32> to vector<2x8x16xf32>
    %302 = arith.mulf %300, %301 : vector<2x8x16xf32>
    %303 = arith.addf %295, %302 : vector<2x8x16xf32>
    %c0_119 = arith.constant 0 : index
    %c7_120 = arith.constant 7 : index
    %c1_121 = arith.constant 1 : index
    %304 = vector.load %arg9[%c0_119, %c7_120, %c1_121] : memref<2x8x18xf32, #tpu.memory_space<vmem>>, vector<2x1x16xf32>
    %305 = vector.extract_strided_slice %128 {offsets = [22, 0, 0], sizes = [1, 8, 1], strides = [1, 1, 1]} : vector<24x8x1xf32> to vector<1x8x1xf32>
    %306 = vector.shape_cast %305 : vector<1x8x1xf32> to vector<8x1xf32>
    %307 = vector.shape_cast %306 : vector<8x1xf32> to vector<1x8x1xf32>
    %308 = vector.broadcast %307 : vector<1x8x1xf32> to vector<2x8x16xf32>
    %309 = vector.broadcast %304 : vector<2x1x16xf32> to vector<2x8x16xf32>
    %310 = arith.mulf %308, %309 : vector<2x8x16xf32>
    %311 = arith.addf %303, %310 : vector<2x8x16xf32>
    %c0_122 = arith.constant 0 : index
    %c7_123 = arith.constant 7 : index
    %c2_124 = arith.constant 2 : index
    %312 = vector.load %arg9[%c0_122, %c7_123, %c2_124] : memref<2x8x18xf32, #tpu.memory_space<vmem>>, vector<2x1x16xf32>
    %313 = vector.extract_strided_slice %128 {offsets = [23, 0, 0], sizes = [1, 8, 1], strides = [1, 1, 1]} : vector<24x8x1xf32> to vector<1x8x1xf32>
    %314 = vector.shape_cast %313 : vector<1x8x1xf32> to vector<8x1xf32>
    %315 = vector.shape_cast %314 : vector<8x1xf32> to vector<1x8x1xf32>
    %316 = vector.broadcast %315 : vector<1x8x1xf32> to vector<2x8x16xf32>
    %317 = vector.broadcast %312 : vector<2x1x16xf32> to vector<2x8x16xf32>
    %318 = arith.mulf %316, %317 : vector<2x8x16xf32>
    %319 = arith.addf %311, %318 : vector<2x8x16xf32>
    %cst_125 = arith.constant dense<0.000000e+00> : vector<8xf32>
    %320 = vector.multi_reduction <add>, %319, %cst_125 [0, 2] : vector<2x8x16xf32> to vector<8xf32>
    %321 = vector.shape_cast %320 : vector<8xf32> to vector<1x8x1xf32>
    %322 = arith.mulf %319, %319 : vector<2x8x16xf32>
    %cst_126 = arith.constant dense<0.000000e+00> : vector<8xf32>
    %323 = vector.multi_reduction <add>, %322, %cst_126 [0, 2] : vector<2x8x16xf32> to vector<8xf32>
    %324 = vector.shape_cast %323 : vector<8xf32> to vector<1x8x1xf32>
    %cst_127 = arith.constant 3.125000e-02 : f32
    %325 = vector.broadcast %cst_127 : f32 to vector<1x8x1xf32>
    %326 = arith.mulf %321, %325 : vector<1x8x1xf32>
    %cst_128 = arith.constant 3.125000e-02 : f32
    %327 = vector.broadcast %cst_128 : f32 to vector<1x8x1xf32>
    %328 = arith.mulf %324, %327 : vector<1x8x1xf32>
    %329 = arith.mulf %326, %326 : vector<1x8x1xf32>
    %330 = arith.subf %328, %329 : vector<1x8x1xf32>
    %c0_129 = arith.constant 0 : index
    %c0_130 = arith.constant 0 : index
    %331 = vector.load %arg6[%c0_129, %c0_130] : memref<8x1xf32, #tpu.memory_space<vmem>>, vector<8x1xf32>
    %332 = vector.shape_cast %331 : vector<8x1xf32> to vector<1x8x1xf32>
    %cst_131 = arith.constant 9.99999974E-6 : f32
    %333 = vector.broadcast %cst_131 : f32 to vector<1x8x1xf32>
    %334 = arith.addf %330, %333 : vector<1x8x1xf32>
    %335 = math.rsqrt %334 : vector<1x8x1xf32>
    %336 = arith.mulf %332, %335 : vector<1x8x1xf32>
    %c0_132 = arith.constant 0 : index
    %c0_133 = arith.constant 0 : index
    %337 = vector.load %arg7[%c0_132, %c0_133] : memref<8x1xf32, #tpu.memory_space<vmem>>, vector<8x1xf32>
    %338 = vector.shape_cast %337 : vector<8x1xf32> to vector<1x8x1xf32>
    %339 = arith.mulf %326, %336 : vector<1x8x1xf32>
    %340 = arith.subf %338, %339 : vector<1x8x1xf32>
    %341 = vector.broadcast %336 : vector<1x8x1xf32> to vector<2x8x16xf32>
    %342 = arith.mulf %319, %341 : vector<2x8x16xf32>
    %343 = vector.broadcast %340 : vector<1x8x1xf32> to vector<2x8x16xf32>
    %344 = arith.addf %342, %343 : vector<2x8x16xf32>
    %cst_134 = arith.constant 0.000000e+00 : f32
    %345 = vector.broadcast %cst_134 : f32 to vector<2x8x16xf32>
    %346 = arith.maximumf %344, %345 : vector<2x8x16xf32>
    %c0_135 = arith.constant 0 : index
    %c0_136 = arith.constant 0 : index
    %c0_137 = arith.constant 0 : index
    %347 = vector.load %arg8[%c0_135, %c0_136, %c0_137] : memref<2x8x16xf32, #tpu.memory_space<vmem>>, vector<2x8x16xf32>
    tpu.vector_store %arg8[%c0_135, %c0_136, %c0_137], %346 {strides = array<i32>} : memref<2x8x16xf32, #tpu.memory_space<vmem>>, vector<2x8x16xf32>,
    return
  }
  func.func @transform_0(%arg0: i32) -> (i32, i32, i32) {
    %c0_i32 = arith.constant 0 : i32
    %c0_i32_0 = arith.constant 0 : i32
    %c0_i32_1 = arith.constant 0 : i32
    %c0_i32_2 = arith.constant 0 : i32
    return %c0_i32, %c0_i32_0, %c0_i32_1 : i32, i32, i32
  }
  func.func @transform_1(%arg0: i32) -> (i32, i32, i32) {
    %c0_i32 = arith.constant 0 : i32
    %c0_i32_0 = arith.constant 0 : i32
    %c0_i32_1 = arith.constant 0 : i32
    %c0_i32_2 = arith.constant 0 : i32
    return %c0_i32, %c0_i32_0, %c0_i32_1 : i32, i32, i32
  }
  func.func @transform_2(%arg0: i32) -> (i32, i32) {
    %c0_i32 = arith.constant 0 : i32
    %c0_i32_0 = arith.constant 0 : i32
    %c0_i32_1 = arith.constant 0 : i32
    return %c0_i32, %c0_i32_0 : i32, i32
  }
  func.func @transform_3(%arg0: i32) -> (i32, i32) {
    %c0_i32 = arith.constant 0 : i32
    %c0_i32_0 = arith.constant 0 : i32
    %c0_i32_1 = arith.constant 0 : i32
    return %c0_i32, %c0_i32_0 : i32, i32
  }
  func.func @transform_4(%arg0: i32) -> (i32, i32, i32) {
    %c0_i32 = arith.constant 0 : i32
    %c0_i32_0 = arith.constant 0 : i32
    %c0_i32_1 = arith.constant 0 : i32
    %c0_i32_2 = arith.constant 0 : i32
    return %c0_i32, %c0_i32_0, %c0_i32_1 : i32, i32, i32
  }
  func.func @transform_5(%arg0: i32) -> (i32, i32) {
    %c0_i32 = arith.constant 0 : i32
    %c0_i32_0 = arith.constant 0 : i32
    %c0_i32_1 = arith.constant 0 : i32
    return %c0_i32, %c0_i32_0 : i32, i32
  }
  func.func @transform_6(%arg0: i32) -> (i32, i32) {
    %c0_i32 = arith.constant 0 : i32
    %c0_i32_0 = arith.constant 0 : i32
    %c0_i32_1 = arith.constant 0 : i32
    return %c0_i32, %c0_i32_0 : i32, i32
  }
  func.func @transform_7(%arg0: i32) -> (i32, i32, i32) {
    %c0_i32 = arith.constant 0 : i32
    %c0_i32_0 = arith.constant 0 : i32
    %c0_i32_1 = arith.constant 0 : i32
    %c0_i32_2 = arith.constant 0 : i32
    return %c0_i32, %c0_i32_0, %c0_i32_1 : i32, i32, i32
  }
}

</mosaic_0001>

<bundles_post_ra>
// kernel: tpu_custom_call.1
= control target key start
LH: loop header
LB: loop body
LE: loop exit
PB: predicated region body
PF: predicated region fallthrough
CT: control target
= control target key end

     0   :  { %v871_v2 = vmov 0   ;;  %s1221_s0 = inlined_call_operand.vmem [shape: f32[2,4,18], index: 0, kind: input, shape index: {}]   ;;  %s1222_s1 = inlined_call_operand.vmem [shape: f32[12,8,1], index: 1, kind: input, shape index: {}]   ;;  %s1223_s2 = inlined_call_operand.vmem [shape: f32[8,1], index: 2, kind: input, shape index: {}]   ;;  %s1224_s3 = inlined_call_operand.vmem [shape: f32[8,1], index: 3, kind: input, shape index: {}]   ;;  %s1225_s4 = inlined_call_operand.vmem [shape: f32[24,8,1], index: 4, kind: input, shape index: {}]   ;;  %s1226_s5 = inlined_call_operand.vmem [shape: f32[8,1], index: 5, kind: input, shape index: {}]   ;;  %s1227_s6 = inlined_call_operand.vmem [shape: f32[8,1], index: 6, kind: input, shape index: {}]   ;;  %s1228_s7 = inlined_call_operand.hbm [shape: f32[2,8,16], index: 7, kind: output, shape index: {}]  }
   0x1   :  { %v31_v0 = vld [vmem:[%s1222_s1 + $0x20] sm:$0xff]  ;;  %v28_v1 = vld [vmem:[%s1222_s1 + $0x8] sm:$0xff]  ;;  %842 = vset.pattern.permute.xlu1 %v871_v2  ;;  %841 = vset.pattern.permute.xlu0 %v871_v2  ;;  %v29_v4 = vld [vmem:[%s1222_s1 + $0x10] sm:$0xff] }
   0x2   :  { %111 = vperm.xlu1 %842, %v31_v0   ;;  %58 = vperm.xlu0 %841, %v28_v1   ;;  %v32_v3 = vld [vmem:[%s1222_s1 + $0x28] sm:$0xff] }
   0x3   :  { %12 = vsyncpa [#allocation4], 0  ;;  %v35_v5 = vld [vmem:[%s1222_s1 + $0x40] sm:$0xff]  ;;  %v34_v6 = vld [vmem:[%s1222_s1 + $0x38] sm:$0xff]  ;;  %s872_s29 = smov 127   ;;  %s873_s10 = smov 126  }
   0x4   :  { %v38_v7 = vld [vmem:[%s1222_s1 + $0x58] sm:$0xff]  ;;  %v37_v8 = vld [vmem:[%s1222_s1 + $0x50] sm:$0xff]  ;;  %v27_v10 = vld [vmem:[%s1222_s1] sm:$0xff]  ;;  %vm249_vm0 = vcmask 130048   ;;  %vm289_vm1 = vcmask 7168   ;;  %vm292_vm2 = vcmask 146568  }
   0x5   :  { %v30_v9 = vld [vmem:[%s1222_s1 + $0x18] sm:$0xff]  ;;  %v36_v11 = vld [vmem:[%s1222_s1 + $0x48] sm:$0xff]  ;;  %v33_v12 = vld [vmem:[%s1222_s1 + $0x30] sm:$0xff]  ;;  %vm303_vm3 = vcmask 138248  }
   0x6   :  { %128 = vperm.xlu1 %842, %v32_v3   ;;  %75 = vperm.xlu0 %841, %v29_v4   ;;  %v809_v13 = vld [vmem:[%s1221_s0] ss:$0 sm:$0xff]  ;;  %v810_v14 = vld [vmem:[%s1221_s0 + $0x4] ss:$0 sm:$0xff]  ;;  %v811_v18 = vld [vmem:[%s1221_s0 + $0x1] ss:$0 sm:$0xff] }
   0x7   :  { %v812_v19 = vld [vmem:[%s1221_s0 + $0x5] ss:$0 sm:$0xff]  ;;  %v813_v29 = vld [vmem:[%s1221_s0 + $0x2] ss:$0 sm:$0xff]  ;;  %v814_v30 = vld [vmem:[%s1221_s0 + $0x6] ss:$0 sm:$0xff] }
   0x8   :  { %v815_v37 = vld [vmem:[%s1221_s0 + $0x3] ss:$0 sm:$0xff]  ;;  %v816_v38 = vld [vmem:[%s1221_s0 + $0x7] ss:$0 sm:$0xff] }
   0xa   :  { %181 = vperm.xlu1 %842, %v35_v5   ;;  %164 = vperm.xlu0 %841, %v34_v6  }
   0xe   :  { %234 = vperm.xlu1 %842, %v38_v7   ;;  %217 = vperm.xlu0 %841, %v37_v8  }
  0x12   :  { %94 = vperm.xlu1 %842, %v30_v9   ;;  %43 = vperm.xlu0 %841, %v27_v10  }
  0x16   :  { %200 = vperm.xlu1 %842, %v36_v11   ;;  %147 = vperm.xlu0 %841, %v33_v12  }
  0x81   :  { %v59_v15 = vpop.permute.xlu0 %58  ;;  %v112_v23 = vpop.permute.xlu1 %111 }
  0x82   :  { %v61_v16 = vmul.f32 %v809_v13, %v59_v15  ;;  %v62_v17 = vmul.f32 %v810_v14, %v59_v15  ;;  %v114_v24 = vmul.f32 %v811_v18, %v112_v23  ;;  %v115_v25 = vmul.f32 %v812_v19, %v112_v23 }
  0x84   :  { %67 = vrot.lane.b32.xlu1 %v62_v17, %s872_s29  ;;  %65 = vrot.lane.b32.xlu0 %v61_v16, %s872_s29 }
  0x85   :  { %v76_v20 = vpop.permute.xlu0 %75  ;;  %v129_v26 = vpop.permute.xlu1 %128 }
  0x86   :  { %v78_v21 = vmul.f32 %v809_v13, %v76_v20  ;;  %v79_v22 = vmul.f32 %v810_v14, %v76_v20  ;;  %v131_v27 = vmul.f32 %v811_v18, %v129_v26  ;;  %v132_v28 = vmul.f32 %v812_v19, %v129_v26 }
  0x88   :  { %82 = vrot.lane.b32.xlu1 %v78_v21, %s873_s10  ;;  %84 = vrot.lane.b32.xlu0 %v79_v22, %s873_s10 }
  0x89   :  { %v165_v31 = vpop.permute.xlu0 %164  ;;  %v182_v34 = vpop.permute.xlu1 %181 }
  0x8a   :  { %v167_v32 = vmul.f32 %v813_v29, %v165_v31  ;;  %v168_v33 = vmul.f32 %v814_v30, %v165_v31  ;;  %v184_v35 = vmul.f32 %v813_v29, %v182_v34  ;;  %v185_v36 = vmul.f32 %v814_v30, %v182_v34 }
  0x8c   :  { %118 = vrot.lane.b32.xlu1 %v114_v24, %s872_s29  ;;  %120 = vrot.lane.b32.xlu0 %v115_v25, %s872_s29 }
  0x8d   :  { %v218_v39 = vpop.permute.xlu0 %217  ;;  %v235_v42 = vpop.permute.xlu1 %234 }
  0x8e   :  { %v220_v40 = vmul.f32 %v815_v37, %v218_v39  ;;  %v221_v41 = vmul.f32 %v816_v38, %v218_v39  ;;  %v237_v43 = vmul.f32 %v815_v37, %v235_v42  ;;  %v238_v44 = vmul.f32 %v816_v38, %v235_v42 }
  0x90   :  { %137 = vrot.lane.b32.xlu1 %v132_v28, %s873_s10  ;;  %135 = vrot.lane.b32.xlu0 %v131_v27, %s873_s10 }
  0x91   :  { %v95_v45 = vpop.permute.xlu1 %94  ;;  %v44_v46 = vpop.permute.xlu0 %43 }
  0x92   :  { %v54_v51 = vmul.f32 %v809_v13, %v44_v46  ;;  %v55_v52 = vmul.f32 %v810_v14, %v44_v46  ;;  %v105_v57 = vmul.f32 %v811_v18, %v95_v45  ;;  %v106_v58 = vmul.f32 %v812_v19, %v95_v45  ;;  %v266_v46 = vld [vmem:[%s1223_s2] sm:$0xff]  ;;  %s875_s2 = smov 1  }
  0x94   :  { %173 = vrot.lane.b32.xlu1 %v168_v33, %s872_s29  ;;  %171 = vrot.lane.b32.xlu0 %v167_v32, %s872_s29 }
  0x95   :  { %v201_v47 = vpop.permute.xlu1 %200  ;;  %v148_v48 = vpop.permute.xlu0 %147 }
  0x96   :  { %v158_v5 = vmul.f32 %v813_v29, %v148_v48  ;;  %v159_v6 = vmul.f32 %v814_v30, %v148_v48  ;;  %v211_v17 = vmul.f32 %v815_v37, %v201_v47  ;;  %v212_v18 = vmul.f32 %v816_v38, %v201_v47 }
  0x98   :  { %190 = vrot.lane.b32.xlu1 %v185_v36, %s873_s10  ;;  %188 = vrot.lane.b32.xlu0 %v184_v35, %s873_s10 }
  0x9c   :  { %226 = vrot.lane.b32.xlu1 %v221_v41, %s872_s29  ;;  %224 = vrot.lane.b32.xlu0 %v220_v40, %s872_s29 }
  0xa0   :  { %243 = vrot.lane.b32.xlu1 %v238_v44, %s873_s10  ;;  %241 = vrot.lane.b32.xlu0 %v237_v43, %s873_s10 }
  0xf6   :  { %v68_v49 = vpop.permute.xlu1 %67  ;;  %v66_v50 = vpop.permute.xlu0 %65 }
  0xf7   :  { %v72_v53 = vadd.f32 %v68_v49, %v55_v52  ;;  %v71_v54 = vadd.f32 %v66_v50, %v54_v51  ;;  %v270_v49 = vld [vmem:[%s1224_s3] sm:$0xff]  ;;  %v874_v52 = vmov 0.0  }
  0xf8   :  { %291 = vst.msk [vmem:[#allocation2 + $0x8] sm:$0xff] %vm289_vm1, %v874_v52  ;;  %290 = vst.msk [vmem:[#allocation2] sm:$0xff] %vm289_vm1, %v874_v52 }
  0xf9   :  { %294 = vst.msk [vmem:[#allocation2 + $0x8] sm:$0xff] %vm292_vm2, %v874_v52  ;;  %293 = vst.msk [vmem:[#allocation2] sm:$0xff] %vm292_vm2, %v874_v52 }
  0xfa   :  { %v83_v55 = vpop.permute.xlu1 %82  ;;  %v85_v56 = vpop.permute.xlu0 %84 }
  0xfb   :  { %v88_v59 = vadd.f32 %v83_v55, %v71_v54  ;;  %v89_v60 = vadd.f32 %v85_v56, %v72_v53 }
  0xfd   :  { %v107_v61 = vadd.f32 %v105_v57, %v88_v59  ;;  %v108_v62 = vadd.f32 %v106_v58, %v89_v60 }
  0xfe   :  { %v119_v63 = vpop.permute.xlu1 %118  ;;  %v121_v0 = vpop.permute.xlu0 %120 }
  0xff   :  { %v124_v1 = vadd.f32 %v119_v63, %v107_v61  ;;  %v125_v2 = vadd.f32 %v121_v0, %v108_v62  ;;  %v308_v61 = vld [vmem:[%s1225_s4 + $0x10] sm:$0xff]  ;;  %v307_v62 = vld [vmem:[%s1225_s4 + $0x8] sm:$0xff]  ;;  %v310_v0 = vld [vmem:[%s1225_s4 + $0x20] sm:$0xff] }
 0x100   :  { %v311_v63 = vld [vmem:[%s1225_s4 + $0x28] sm:$0xff] }
 0x102   :  { %v138_v3 = vpop.permute.xlu1 %137  ;;  %v136_v4 = vpop.permute.xlu0 %135 }
 0x103   :  { %v142_v7 = vadd.f32 %v138_v3, %v125_v2  ;;  %v141_v8 = vadd.f32 %v136_v4, %v124_v1  ;;  %v314_v1 = vld [vmem:[%s1225_s4 + $0x40] sm:$0xff]  ;;  %v313_v2 = vld [vmem:[%s1225_s4 + $0x38] sm:$0xff]  ;;  %v316_v4 = vld [vmem:[%s1225_s4 + $0x50] sm:$0xff] }
 0x104   :  { %v317_v3 = vld [vmem:[%s1225_s4 + $0x58] sm:$0xff] }
 0x105   :  { %v161_v9 = vadd.f32 %v159_v6, %v142_v7  ;;  %v160_v10 = vadd.f32 %v158_v5, %v141_v8  ;;  %v320_v5 = vld [vmem:[%s1225_s4 + $0x70] sm:$0xff]  ;;  %v319_v6 = vld [vmem:[%s1225_s4 + $0x68] sm:$0xff]  ;;  %v322_v8 = vld [vmem:[%s1225_s4 + $0x80] sm:$0xff] }
 0x106   :  { %v174_v11 = vpop.permute.xlu1 %173  ;;  %v172_v12 = vpop.permute.xlu0 %171  ;;  %v323_v7 = vld [vmem:[%s1225_s4 + $0x88] sm:$0xff] }
 0x107   :  { %v178_v13 = vadd.f32 %v174_v11, %v161_v9  ;;  %v177_v14 = vadd.f32 %v172_v12, %v160_v10  ;;  %v326_v9 = vld [vmem:[%s1225_s4 + $0xa0] sm:$0xff]  ;;  %v325_v10 = vld [vmem:[%s1225_s4 + $0x98] sm:$0xff]  ;;  %v328_v12 = vld [vmem:[%s1225_s4 + $0xb0] sm:$0xff] }
 0x108   :  { %v329_v11 = vld [vmem:[%s1225_s4 + $0xb8] sm:$0xff] }
 0x10a   :  { %v191_v15 = vpop.permute.xlu1 %190  ;;  %v189_v16 = vpop.permute.xlu0 %188 }
 0x10b   :  { %v195_v19 = vadd.f32 %v191_v15, %v178_v13  ;;  %v194_v20 = vadd.f32 %v189_v16, %v177_v14  ;;  %v309_v13 = vld [vmem:[%s1225_s4 + $0x18] sm:$0xff]  ;;  %v306_v14 = vld [vmem:[%s1225_s4] sm:$0xff]  ;;  %v315_v15 = vld [vmem:[%s1225_s4 + $0x48] sm:$0xff] }
 0x10c   :  { %v312_v16 = vld [vmem:[%s1225_s4 + $0x30] sm:$0xff] }
 0x10d   :  { %v214_v21 = vadd.f32 %v212_v18, %v195_v19  ;;  %v213_v22 = vadd.f32 %v211_v17, %v194_v20  ;;  %v321_v17 = vld [vmem:[%s1225_s4 + $0x78] sm:$0xff]  ;;  %v318_v18 = vld [vmem:[%s1225_s4 + $0x60] sm:$0xff]  ;;  %v327_v19 = vld [vmem:[%s1225_s4 + $0xa8] sm:$0xff] }
 0x10e   :  { %v227_v23 = vpop.permute.xlu1 %226  ;;  %v225_v24 = vpop.permute.xlu0 %224  ;;  %v324_v20 = vld [vmem:[%s1225_s4 + $0x90] sm:$0xff] }
 0x10f   :  { %v231_v25 = vadd.f32 %v227_v23, %v214_v21  ;;  %v230_v26 = vadd.f32 %v225_v24, %v213_v22 }
 0x112   :  { %v244_v27 = vpop.permute.xlu1 %243  ;;  %v242_v28 = vpop.permute.xlu0 %241 }
 0x113   :  { %v248_v29 = vadd.f32 %v244_v27, %v231_v25  ;;  %v247_v30 = vadd.f32 %v242_v28, %v230_v26 }
 0x115   :  { %v250_v31 = vsel %vm249_vm0, %v247_v30, 0.0  ;;  %v251_v32 = vsel %vm249_vm0, %v248_v29, 0.0  ;;  %v255_v33 = vmul.f32 %v247_v30, %v247_v30  ;;  %v256_v34 = vmul.f32 %v248_v29, %v248_v29 }
 0x116   :  { %v252_v35 = vadd.f32 %v251_v32, %v250_v31 }
 0x117   :  { %v257_v36 = vsel %vm249_vm0, %v255_v33, 0.0  ;;  %v258_v37 = vsel %vm249_vm0, %v256_v34, 0.0 }
 0x118   :  { %253 = vadd.xlane.f32.xlu0 %v252_v35  ;;  %v259_v38 = vadd.f32 %v258_v37, %v257_v36 }
 0x11a   :  { %260 = vadd.xlane.f32.xlu1 %v259_v38 }
 0x1a5   :  { %v254_v39 = vpop.xlane.xlu0 %253 }
 0x1a6   :  { %v262_v40 = vmul.f32 0.03125, %v254_v39 }
 0x1a7   :  { %v261_v41 = vpop.xlane.xlu1 %260 }
 0x1a8   :  { %v264_v42 = vmul.f32 %v262_v40, %v262_v40  ;;  %v263_v43 = vmul.f32 0.03125, %v261_v41 }
 0x1aa   :  { %v265_v44 = vsub.f32 %v263_v43, %v264_v42 }
 0x1ac   :  { %v267_v45 = vadd.f32 1e-05, %v265_v44 }
 0x1ae   :  { %843 = vrsqrt.f32 %v267_v45 }
 0x1b8   :  { %v844_v47 = vpop.eup %843 }
 0x1b9   :  { %v269_v48 = vmul.f32 %v844_v47, %v266_v46 }
 0x1bb   :  { %275 = vperm.xlu0 %841, %v269_v48   ;;  %v271_v50 = vmul.f32 %v269_v48, %v262_v40 }
 0x1bd   :  { %v272_v51 = vsub.f32 %v270_v49, %v271_v50 }
 0x1bf   :  { %282 = vperm.xlu1 %842, %v272_v51  }
 0x23a   :  { %v276_v53 = vpop.permute.xlu0 %275 }
 0x23b   :  { %v278_v54 = vmul.f32 %v276_v53, %v247_v30  ;;  %v279_v55 = vmul.f32 %v276_v53, %v248_v29 }
 0x23e   :  { %v283_v56 = vpop.permute.xlu1 %282 }
 0x23f   :  { %v285_v57 = vadd.f32 %v283_v56, %v278_v54  ;;  %v286_v58 = vadd.f32 %v283_v56, %v279_v55 }
 0x241   :  { %v287_v59 = vmax.f32 %v285_v57, 0.0  ;;  %v288_v60 = vmax.f32 %v286_v58, 0.0 }
 0x243   :  { %299 = vrot.lane.b32.xlu1 %v288_v60, %s875_s2  ;;  %297 = vrot.lane.b32.xlu0 %v287_v59, %s875_s2  ;;  %s876_s2 = smov [#allocation3]  }
 0x244   :  { %s798_s3 = sshll.u32 %s876_s2, 4  ;;  %s799_s3 = int_to_ptr.vmem [resolvable:$true] %s798_s3 }
 0x245   :  { %p852_p1 = scmp.lt.s32.totalorder %s799_s3, %s799_s3 }
 0x247   :  { %366 = vperm.xlu1 %842, %v308_v61   ;;  %349 = vperm.xlu0 %841, %v307_v62  }
 0x24b   :  { %419 = vperm.xlu1 %842, %v311_v63   ;;  %402 = vperm.xlu0 %841, %v310_v0  }
 0x24f   :  { %472 = vperm.xlu1 %842, %v314_v1   ;;  %455 = vperm.xlu0 %841, %v313_v2  }
 0x253   :  { %525 = vperm.xlu1 %842, %v317_v3   ;;  %508 = vperm.xlu0 %841, %v316_v4  }
 0x257   :  { %578 = vperm.xlu1 %842, %v320_v5   ;;  %561 = vperm.xlu0 %841, %v319_v6  }
 0x25b   :  { %631 = vperm.xlu1 %842, %v323_v7   ;;  %614 = vperm.xlu0 %841, %v322_v8  }
 0x25f   :  { %684 = vperm.xlu1 %842, %v326_v9   ;;  %667 = vperm.xlu0 %841, %v325_v10  }
 0x263   :  { %737 = vperm.xlu1 %842, %v329_v11   ;;  %720 = vperm.xlu0 %841, %v328_v12  }
 0x267   :  { %385 = vperm.xlu1 %842, %v309_v13   ;;  %334 = vperm.xlu0 %841, %v306_v14  }
 0x26b   :  { %491 = vperm.xlu1 %842, %v315_v15   ;;  %438 = vperm.xlu0 %841, %v312_v16  }
 0x26f   :  { %597 = vperm.xlu1 %842, %v321_v17   ;;  %544 = vperm.xlu0 %841, %v318_v18  }
 0x273   :  { %703 = vperm.xlu1 %842, %v327_v19   ;;  %650 = vperm.xlu0 %841, %v324_v20  }
 0x2b5   :  { %v300_v21 = vpop.permute.xlu1 %299  ;;  %v298_v22 = vpop.permute.xlu0 %297 }
 0x2b6   :  { %305 = vst.msk [vmem:[#allocation2 + $0x8] sm:$0xff] %vm303_vm3, %v300_v21  ;;  %304 = vst.msk [vmem:[#allocation2] sm:$0xff] %vm303_vm3, %v298_v22 }
 0x2bd   :  { %v1077_v23 = vld [vmem:[#allocation2 + $0x8] ss:$0 sm:$0xff]  ;;  %v1079_v24 = vld [vmem:[#allocation2] ss:$0 sm:$0xff]  ;;  %v1089_v32 = vld [vmem:[#allocation2 + $0x9] ss:$0 sm:$0xff] }
 0x2be   :  { %v1091_v33 = vld [vmem:[#allocation2 + $0x1] ss:$0 sm:$0xff]  ;;  %v1101_v40 = vld [vmem:[#allocation2 + $0xa] ss:$0 sm:$0xff]  ;;  %v1103_v41 = vld [vmem:[#allocation2 + $0x2] ss:$0 sm:$0xff] }
 0x2bf   :  { %v1113_v48 = vld [vmem:[#allocation2 + $0xb] ss:$0 sm:$0xff]  ;;  %v1115_v49 = vld [vmem:[#allocation2 + $0x3] ss:$0 sm:$0xff]  ;;  %v1125_v56 = vld [vmem:[#allocation2 + $0xc] ss:$0 sm:$0xff] }
 0x2c0   :  { %v1127_v57 = vld [vmem:[#allocation2 + $0x4] ss:$0 sm:$0xff]  ;;  %v1137_v0 = vld [vmem:[#allocation2 + $0xd] ss:$0 sm:$0xff]  ;;  %v1139_v1 = vld [vmem:[#allocation2 + $0x5] ss:$0 sm:$0xff] }
 0x2c1   :  { %v1149_v8 = vld [vmem:[#allocation2 + $0xe] ss:$0 sm:$0xff]  ;;  %v1151_v9 = vld [vmem:[#allocation2 + $0x6] ss:$0 sm:$0xff]  ;;  %v1161_v16 = vld [vmem:[#allocation2 + $0xf] ss:$0 sm:$0xff] }
 0x2c2   :  { %v1163_v17 = vld [vmem:[#allocation2 + $0x7] ss:$0 sm:$0xff] }
 0x2c6   :  { %v350_v25 = vpop.permute.xlu0 %349  ;;  %v367_v28 = vpop.permute.xlu1 %366 }
 0x2c7   :  { %v352_v26 = vmul.f32 %v1079_v24, %v350_v25  ;;  %v353_v27 = vmul.f32 %v1077_v23, %v350_v25  ;;  %v369_v29 = vmul.f32 %v1079_v24, %v367_v28  ;;  %v370_v30 = vmul.f32 %v1077_v23, %v367_v28 }
 0x2c9   :  { %358 = vrot.lane.b32.xlu1 %v353_v27, %s872_s29  ;;  %356 = vrot.lane.b32.xlu0 %v352_v26, %s872_s29 }
 0x2ca   :  { %v403_v31 = vpop.permute.xlu0 %402  ;;  %v420_v36 = vpop.permute.xlu1 %419 }
 0x2cb   :  { %v405_v34 = vmul.f32 %v1091_v33, %v403_v31  ;;  %v406_v35 = vmul.f32 %v1089_v32, %v403_v31  ;;  %v422_v37 = vmul.f32 %v1091_v33, %v420_v36  ;;  %v423_v38 = vmul.f32 %v1089_v32, %v420_v36 }
 0x2cd   :  { %373 = vrot.lane.b32.xlu1 %v369_v29, %s873_s10  ;;  %375 = vrot.lane.b32.xlu0 %v370_v30, %s873_s10 }
 0x2ce   :  { %v456_v39 = vpop.permute.xlu0 %455  ;;  %v473_v44 = vpop.permute.xlu1 %472 }
 0x2cf   :  { %v458_v42 = vmul.f32 %v1103_v41, %v456_v39  ;;  %v459_v43 = vmul.f32 %v1101_v40, %v456_v39  ;;  %v475_v45 = vmul.f32 %v1103_v41, %v473_v44  ;;  %v476_v46 = vmul.f32 %v1101_v40, %v473_v44 }
 0x2d1   :  { %411 = vrot.lane.b32.xlu0 %v406_v35, %s872_s29  ;;  %409 = vrot.lane.b32.xlu1 %v405_v34, %s872_s29 }
 0x2d2   :  { %v509_v47 = vpop.permute.xlu0 %508  ;;  %v526_v52 = vpop.permute.xlu1 %525 }
 0x2d3   :  { %v511_v50 = vmul.f32 %v1115_v49, %v509_v47  ;;  %v512_v51 = vmul.f32 %v1113_v48, %v509_v47  ;;  %v528_v53 = vmul.f32 %v1115_v49, %v526_v52  ;;  %v529_v54 = vmul.f32 %v1113_v48, %v526_v52 }
 0x2d5   :  { %426 = vrot.lane.b32.xlu0 %v422_v37, %s873_s10  ;;  %428 = vrot.lane.b32.xlu1 %v423_v38, %s873_s10 }
 0x2d6   :  { %v562_v55 = vpop.permute.xlu0 %561  ;;  %v579_v60 = vpop.permute.xlu1 %578 }
 0x2d7   :  { %v564_v58 = vmul.f32 %v1127_v57, %v562_v55  ;;  %v565_v59 = vmul.f32 %v1125_v56, %v562_v55  ;;  %v581_v61 = vmul.f32 %v1127_v57, %v579_v60  ;;  %v582_v62 = vmul.f32 %v1125_v56, %v579_v60 }
 0x2d9   :  { %464 = vrot.lane.b32.xlu1 %v459_v43, %s872_s29  ;;  %462 = vrot.lane.b32.xlu0 %v458_v42, %s872_s29 }
 0x2da   :  { %v615_v63 = vpop.permute.xlu0 %614  ;;  %v632_v4 = vpop.permute.xlu1 %631 }
 0x2db   :  { %v617_v2 = vmul.f32 %v1139_v1, %v615_v63  ;;  %v618_v3 = vmul.f32 %v1137_v0, %v615_v63  ;;  %v634_v5 = vmul.f32 %v1139_v1, %v632_v4  ;;  %v635_v6 = vmul.f32 %v1137_v0, %v632_v4 }
 0x2dd   :  { %479 = vrot.lane.b32.xlu1 %v475_v45, %s873_s10  ;;  %481 = vrot.lane.b32.xlu0 %v476_v46, %s873_s10 }
 0x2de   :  { %v668_v7 = vpop.permute.xlu0 %667  ;;  %v685_v12 = vpop.permute.xlu1 %684 }
 0x2df   :  { %v670_v10 = vmul.f32 %v1151_v9, %v668_v7  ;;  %v671_v11 = vmul.f32 %v1149_v8, %v668_v7  ;;  %v687_v13 = vmul.f32 %v1151_v9, %v685_v12  ;;  %v688_v14 = vmul.f32 %v1149_v8, %v685_v12 }
 0x2e1   :  { %517 = vrot.lane.b32.xlu0 %v512_v51, %s872_s29  ;;  %515 = vrot.lane.b32.xlu1 %v511_v50, %s872_s29 }
 0x2e2   :  { %v721_v15 = vpop.permute.xlu0 %720  ;;  %v738_v20 = vpop.permute.xlu1 %737 }
 0x2e3   :  { %v723_v18 = vmul.f32 %v1163_v17, %v721_v15  ;;  %v724_v19 = vmul.f32 %v1161_v16, %v721_v15  ;;  %v740_v21 = vmul.f32 %v1163_v17, %v738_v20  ;;  %v741_v22 = vmul.f32 %v1161_v16, %v738_v20 }
 0x2e5   :  { %532 = vrot.lane.b32.xlu0 %v528_v53, %s873_s10  ;;  %534 = vrot.lane.b32.xlu1 %v529_v54, %s873_s10 }
 0x2e6   :  { %v386_v25 = vpop.permute.xlu1 %385  ;;  %v335_v26 = vpop.permute.xlu0 %334 }
 0x2e7   :  { %v345_v37 = vmul.f32 %v1079_v24, %v335_v26  ;;  %v346_v38 = vmul.f32 %v1077_v23, %v335_v26  ;;  %v396_v45 = vmul.f32 %v1091_v33, %v386_v25  ;;  %v397_v46 = vmul.f32 %v1089_v32, %v386_v25 }
 0x2e9   :  { %570 = vrot.lane.b32.xlu1 %v565_v59, %s872_s29  ;;  %568 = vrot.lane.b32.xlu0 %v564_v58, %s872_s29 }
 0x2ea   :  { %v492_v27 = vpop.permute.xlu1 %491  ;;  %v439_v28 = vpop.permute.xlu0 %438 }
 0x2eb   :  { %v449_v23 = vmul.f32 %v1103_v41, %v439_v28  ;;  %v450_v60 = vmul.f32 %v1101_v40, %v439_v28  ;;  %v502_v7 = vmul.f32 %v1115_v49, %v492_v27 }
 0x2ed   :  { %585 = vrot.lane.b32.xlu1 %v581_v61, %s873_s10  ;;  %587 = vrot.lane.b32.xlu0 %v582_v62, %s873_s10 }
 0x2ee   :  { %v598_v29 = vpop.permute.xlu1 %597  ;;  %v545_v30 = vpop.permute.xlu0 %544 }
 0x2f1   :  { %623 = vrot.lane.b32.xlu0 %v618_v3, %s872_s29  ;;  %621 = vrot.lane.b32.xlu1 %v617_v2, %s872_s29 }
 0x2f2   :  { %v1173_v31 = vpop.permute.xlu1 %703  ;;  %v1175_v34 = vpop.permute.xlu0 %650 }
 0x2f5   :  { %638 = vrot.lane.b32.xlu0 %v634_v5, %s873_s10  ;;  %640 = vrot.lane.b32.xlu1 %v635_v6, %s873_s10 }
 0x2f9   :  { %676 = vrot.lane.b32.xlu1 %v671_v11, %s872_s29  ;;  %674 = vrot.lane.b32.xlu0 %v670_v10, %s872_s29  ;;  %v503_v10 = vmul.f32 %v1113_v48, %v492_v27 }
 0x2fd   :  { %693 = vrot.lane.b32.xlu1 %v688_v14, %s873_s10  ;;  %691 = vrot.lane.b32.xlu0 %v687_v13, %s873_s10 }
 0x301   :  { %729 = vrot.lane.b32.xlu1 %v724_v19, %s872_s29  ;;  %727 = vrot.lane.b32.xlu0 %v723_v18, %s872_s29 }
 0x305   :  { %746 = vrot.lane.b32.xlu1 %v741_v22, %s873_s10  ;;  %744 = vrot.lane.b32.xlu0 %v740_v21, %s873_s10  ;;  %v555_v21 = vmul.f32 %v1127_v57, %v545_v30  ;;  %v556_v22 = vmul.f32 %v1125_v56, %v545_v30 }
 0x33b   :  { %v359_v35 = vpop.permute.xlu1 %358  ;;  %v357_v36 = vpop.permute.xlu0 %356 }
 0x33c   :  { %v363_v39 = vadd.f32 %v359_v35, %v346_v38  ;;  %v362_v42 = vadd.f32 %v357_v36, %v345_v37 }
 0x33f   :  { %v374_v43 = vpop.permute.xlu1 %373  ;;  %v376_v44 = vpop.permute.xlu0 %375 }
 0x340   :  { %v379_v47 = vadd.f32 %v374_v43, %v362_v42  ;;  %v380_v50 = vadd.f32 %v376_v44, %v363_v39  ;;  %v608_v39 = vmul.f32 %v1139_v1, %v598_v29  ;;  %v609_v42 = vmul.f32 %v1137_v0, %v598_v29 }
 0x342   :  { %v398_v51 = vadd.f32 %v396_v45, %v379_v47  ;;  %v399_v52 = vadd.f32 %v397_v46, %v380_v50 }
 0x343   :  { %v410_v53 = vpop.permute.xlu1 %409  ;;  %v412_v54 = vpop.permute.xlu0 %411 }
 0x344   :  { %v415_v55 = vadd.f32 %v410_v53, %v398_v51  ;;  %v416_v58 = vadd.f32 %v412_v54, %v399_v52  ;;  %v661_v52 = vmul.f32 %v1151_v9, %v1175_v34  ;;  %v662_v53 = vmul.f32 %v1149_v8, %v1175_v34 }
 0x347   :  { %v429_v59 = vpop.permute.xlu1 %428  ;;  %v427_v24 = vpop.permute.xlu0 %426 }
 0x348   :  { %v433_v61 = vadd.f32 %v429_v59, %v416_v58  ;;  %v432_v62 = vadd.f32 %v427_v24, %v415_v55 }
 0x34a   :  { %v452_v63 = vadd.f32 %v450_v60, %v433_v61  ;;  %v451_v33 = vadd.f32 %v449_v23, %v432_v62  ;;  %v714_v61 = vmul.f32 %v1163_v17, %v1173_v31  ;;  %v715_v62 = vmul.f32 %v1161_v16, %v1173_v31 }
 0x34b   :  { %v465_v2 = vpop.permute.xlu1 %464  ;;  %v463_v32 = vpop.permute.xlu0 %462 }
 0x34c   :  { %v469_v3 = vadd.f32 %v465_v2, %v452_v63  ;;  %v468_v4 = vadd.f32 %v463_v32, %v451_v33 }
 0x34f   :  { %v480_v5 = vpop.permute.xlu1 %479  ;;  %v482_v6 = vpop.permute.xlu0 %481 }
 0x350   :  { %v485_v11 = vadd.f32 %v480_v5, %v468_v4  ;;  %v486_v12 = vadd.f32 %v482_v6, %v469_v3 }
 0x352   :  { %v504_v13 = vadd.f32 %v502_v7, %v485_v11  ;;  %v505_v41 = vadd.f32 %v503_v10, %v486_v12 }
 0x353   :  { %v516_v14 = vpop.permute.xlu1 %515  ;;  %v518_v40 = vpop.permute.xlu0 %517 }
 0x354   :  { %v521_v15 = vadd.f32 %v516_v14, %v504_v13  ;;  %v522_v18 = vadd.f32 %v518_v40, %v505_v41 }
 0x357   :  { %v535_v19 = vpop.permute.xlu1 %534  ;;  %v533_v20 = vpop.permute.xlu0 %532 }
 0x358   :  { %v539_v25 = vadd.f32 %v535_v19, %v522_v18  ;;  %v538_v26 = vadd.f32 %v533_v20, %v521_v15 }
 0x35a   :  { %v558_v28 = vadd.f32 %v556_v22, %v539_v25  ;;  %v557_v49 = vadd.f32 %v555_v21, %v538_v26  ;;  %v768_v22 = vld [vmem:[%s1226_s5] sm:$0xff]  ;;  %s847_s5 = scalar_lea.vmem %s799_s3, 256 }
 0x35b   :  { %v571_v35 = vpop.permute.xlu1 %570  ;;  %v569_v48 = vpop.permute.xlu0 %568  ;;  %p848_p0 = scmp.ne.s32.totalorder %s799_s3, %s847_s5  ;;  %p853_p2 = scmp.lt.s32.totalorder %s847_s5, %s847_s5 }
 0x35c   :  { %v575_v27 = vadd.f32 %v571_v35, %v558_v28  ;;  %v574_v36 = vadd.f32 %v569_v48, %v557_v49  ;;  %v772_v28 = vld [vmem:[%s1227_s6] sm:$0xff] }
 0x35d   :  { %p854_p3 = por %p853_p2, %p852_p1 }
 0x35f   :  { %v586_v37 = vpop.permute.xlu1 %585  ;;  %v588_v38 = vpop.permute.xlu0 %587  ;;  %p855_p4 = pnand %p854_p3, %p848_p0 }
 0x360   :  { %v591_v43 = vadd.f32 %v586_v37, %v574_v36  ;;  %v592_v44 = vadd.f32 %v588_v38, %v575_v27 }
 0x362   :  { %v610_v45 = vadd.f32 %v608_v39, %v591_v43  ;;  %v611_v57 = vadd.f32 %v609_v42, %v592_v44 }
 0x363   :  { %v622_v46 = vpop.permute.xlu1 %621  ;;  %v624_v56 = vpop.permute.xlu0 %623 }
 0x364   :  { %v627_v30 = vadd.f32 %v622_v46, %v610_v45  ;;  %v628_v47 = vadd.f32 %v624_v56, %v611_v57 }
 0x367   :  { %v641_v50 = vpop.permute.xlu1 %640  ;;  %v639_v51 = vpop.permute.xlu0 %638 }
 0x368   :  { %v645_v54 = vadd.f32 %v641_v50, %v628_v47  ;;  %v644_v1 = vadd.f32 %v639_v51, %v627_v30 }
 0x36a   :  { %v664_v55 = vadd.f32 %v662_v53, %v645_v54  ;;  %v663_v0 = vadd.f32 %v661_v52, %v644_v1 }
 0x36b   :  { %v677_v29 = vpop.permute.xlu1 %676  ;;  %v675_v58 = vpop.permute.xlu0 %674 }
 0x36c   :  { %v681_v59 = vadd.f32 %v677_v29, %v664_v55  ;;  %v680_v24 = vadd.f32 %v675_v58, %v663_v0 }
 0x36f   :  { %v694_v23 = vpop.permute.xlu1 %693  ;;  %v692_v60 = vpop.permute.xlu0 %691 }
 0x370   :  { %v698_v9 = vadd.f32 %v694_v23, %v681_v59  ;;  %v697_v63 = vadd.f32 %v692_v60, %v680_v24 }
 0x372   :  { %v717_v33 = vadd.f32 %v715_v62, %v698_v9  ;;  %v716_v8 = vadd.f32 %v714_v61, %v697_v63 }
 0x373   :  { %v730_v34 = vpop.permute.xlu1 %729  ;;  %v728_v2 = vpop.permute.xlu0 %727 }
 0x374   :  { %v734_v32 = vadd.f32 %v730_v34, %v717_v33  ;;  %v733_v3 = vadd.f32 %v728_v2, %v716_v8 }
 0x377   :  { %v747_v4 = vpop.permute.xlu1 %746  ;;  %v745_v5 = vpop.permute.xlu0 %744 }
 0x378   :  { %v751_v6 = vadd.f32 %v747_v4, %v734_v32  ;;  %v750_v7 = vadd.f32 %v745_v5, %v733_v3 }
 0x37a   :  { %v752_v10 = vsel %vm249_vm0, %v750_v7, 0.0  ;;  %v753_v11 = vsel %vm249_vm0, %v751_v6, 0.0  ;;  %v757_v17 = vmul.f32 %v750_v7, %v750_v7  ;;  %v758_v12 = vmul.f32 %v751_v6, %v751_v6 }
 0x37b   :  { %v754_v13 = vadd.f32 %v753_v11, %v752_v10 }
 0x37c   :  { %v759_v16 = vsel %vm249_vm0, %v757_v17, 0.0  ;;  %v760_v31 = vsel %vm249_vm0, %v758_v12, 0.0 }
 0x37d   :  { %755 = vadd.xlane.f32.xlu0 %v754_v13  ;;  %v761_v41 = vadd.f32 %v760_v31, %v759_v16 }
 0x37f   :  { %762 = vadd.xlane.f32.xlu1 %v761_v41 }
 0x40a   :  { %v756_v14 = vpop.xlane.xlu0 %755 }
 0x40b   :  { %v764_v40 = vmul.f32 0.03125, %v756_v14 }
 0x40c   :  { %v763_v15 = vpop.xlane.xlu1 %762 }
 0x40d   :  { %v766_v18 = vmul.f32 %v764_v40, %v764_v40  ;;  %v765_v19 = vmul.f32 0.03125, %v763_v15 }
 0x40f   :  { %v767_v20 = vsub.f32 %v765_v19, %v766_v18 }
 0x411   :  { %v769_v21 = vadd.f32 1e-05, %v767_v20 }
 0x413   :  { %845 = vrsqrt.f32 %v769_v21 }
 0x41d   :  { %v846_v25 = vpop.eup %845 }
 0x41e   :  { %v771_v26 = vmul.f32 %v846_v25, %v768_v22 }
 0x420   :  { %777 = vperm.xlu0 %841, %v771_v26   ;;  %v773_v49 = vmul.f32 %v771_v26, %v764_v40 }
 0x422   :  { %v774_v35 = vsub.f32 %v772_v28, %v773_v49 }
 0x424   :  { %784 = vperm.xlu1 %842, %v774_v35  }
 0x49f   :  { %v778_v48 = vpop.permute.xlu0 %777 }
 0x4a0   :  { %v780_v27 = vmul.f32 %v778_v48, %v750_v7  ;;  %v781_v36 = vmul.f32 %v778_v48, %v751_v6 }
 0x4a3   :  { %v785_v37 = vpop.permute.xlu1 %784 }
 0x4a4   :  { %v787_v38 = vadd.f32 %v785_v37, %v780_v27  ;;  %v788_v39 = vadd.f32 %v785_v37, %v781_v36 }
 0x4a6   :  { %v789_v42 = vmax.f32 %v787_v38, 0.0  ;;  %v790_v43 = vmax.f32 %v788_v39, 0.0 }
 0x4a8   :  { %791 = vst.msk [vmem:[#allocation3] sm:$0xff] %vm249_vm0, %v789_v42  ;;  %792 = vst.msk [vmem:[#allocation3 + $0x8] sm:$0xff] %vm249_vm0, %v790_v43 }
 0x4a9   :  { %858 = shalt.err (!%p855_p4)
}
 0x4aa   :  { %s859_s23 = scalar_lea.hbm %s1228_s7, 256 }
 0x4ab   :  { %p860_p5 = scmp.ne.s32.totalorder %s1228_s7, %s859_s23  ;;  %p863_p6 = scmp.lt.u32.totalorder %s859_s23, %s1228_s7 }
 0x4ad   :  { %p865_p7 = pnand %p863_p6, %p860_p5 }
 0x4af   :  { %868 = shalt.err (!%p865_p7)
}
 0x4b0   :  { %s877_s28 = smov 128   ;;  %s878_s30 = smov 8  }
 0x4b1   :  { %804 = dma.vmem_to_hbm [thread:$0]  %s799_s3, 256, %s1228_s7, [#allocation4], %s877_s28, %s877_s28, %s878_s30  }
 0x4b2   :  { %869 = dma.done.wait [#allocation4], 256  }
 0x4b3   :  { %870 = vsyncadd [#allocation4], 4294967040 }
 0x4b4   :  { %808 = vsyncpa [#allocation4], 1 }

</bundles_post_ra>
